<compile_context>
chip_gen: v7x
topology: tpu7x:2x2x1
jax: 0.10.0
libtpu: 0.0.40
codegen_flags: <defaults>
</compile_context>

<pallas_src>
import functools

import numpy as np
import jax
import jax.numpy as jnp
from jax import lax
from jax.experimental import pallas as pl
from jax.experimental.pallas import tpu as pltpu

LEAK = 0.1          # LeakyReLU negative slope
SIMAM_EPS = 1e-4    # self.e_lambda
BN_EPS = 1e-5       # nn.BatchNorm2d default eps
CONV_DTYPE = jnp.bfloat16   # matmul operand dtype; accumulation is always f32


# --------------------------------- kernel ------------------------------------
def _srblock_kernel(xh_ref, xf_ref,
                    w1_ref, b1_ref, g1_ref, be1_ref,
                    w2_ref, b2_ref, g2_ref, be2_ref,
                    pmat_ref,
                    wd_ref, bd_ref, gd_ref, bed_ref,
                    o_ref, pad_scr,
                    *, N, H, W, Cin, P, use_ds):
    f32 = jnp.float32
    WP = W * P
    R = N * H
    inv_cnt = 1.0 / float(N * H * W)

    pm = pmat_ref[...]          # (WP, WP) 0/1 channel-grouping matrix

    def lrelu(v):
        return jnp.where(v >= 0, v, LEAK * v)

    def bn_affine(v2d, g_row, be_row):
        # Training-mode BatchNorm: batch mean / biased variance per channel.
        # Per-channel sums, broadcast back over the folded (w, c) lanes via pm.
        mean = jnp.dot(jnp.sum(v2d, axis=0, keepdims=True), pm,
                       preferred_element_type=f32) * inv_cnt
        d = v2d - mean
        var = jnp.dot(jnp.sum(d * d, axis=0, keepdims=True), pm,
                      preferred_element_type=f32) * inv_cnt
        return d * (g_row * lax.rsqrt(var + BN_EPS)) + be_row

    # ----------------- conv1 (3x3) as 3 banded matmuls over dy ---------------
    out1 = b1_ref[...]
    for dy in range(3):
        lhs = xh_ref[:, dy:dy + H, :].reshape(R, W * Cin).astype(CONV_DTYPE)
        out1 = out1 + jnp.dot(lhs, w1_ref[dy], preferred_element_type=f32)

    act1 = lrelu(bn_affine(out1, g1_ref[...], be1_ref[...]))

    # ------- conv2 (3x3): only the two H halo rows are zeroed in scratch -----
    pad_scr[:, 0:1, :] = jnp.zeros((N, 1, WP), f32)
    pad_scr[:, H + 1:H + 2, :] = jnp.zeros((N, 1, WP), f32)
    pad_scr[:, 1:H + 1, :] = act1.reshape(N, H, WP)

    out2 = b2_ref[...]
    for dy in range(3):
        lhs = pad_scr[:, dy:dy + H, :].reshape(R, WP).astype(CONV_DTYPE)
        out2 = out2 + jnp.dot(lhs, w2_ref[dy], preferred_element_type=f32)

    # ----------------- SimAM attention (per image, per channel) --------------
    o3 = out2.reshape(N, H, WP)
    mu = jnp.dot(jnp.sum(o3, axis=1), pm,
                 preferred_element_type=f32) / float(H * W)
    d3 = (o3 - mu[:, None, :]) ** 2
    dsum = jnp.dot(jnp.sum(d3, axis=1), pm, preferred_element_type=f32)
    y3 = d3 / (4.0 * (dsum[:, None, :] / float(H * W - 1) + SIMAM_EPS)) + 0.5
    att = (o3 * jax.nn.sigmoid(y3)).reshape(R, WP)

    out_bn2 = bn_affine(att, g2_ref[...], be2_ref[...])

    # ----------------- identity / downsample (1x1 conv + BN) -----------------
    if use_ds:
        ds = jnp.dot(xf_ref[...].astype(CONV_DTYPE), wd_ref[...],
                     preferred_element_type=f32) + bd_ref[...]
        ident = bn_affine(ds, gd_ref[...], bed_ref[...])
    else:
        ident = xf_ref[...]

    # Residual add + final LeakyReLU; lane-dense (N*H, W*P) store.
    o_ref[...] = lrelu(out_bn2 + ident)


# ---------------------- one-time parameter preparation ------------------------
def _band_mats(w_oihw, W):
    """(Cout,Cin,3,3) -> (3, W*Cin, W*Cout) banded matrices (zero-pad conv in W)."""
    w_np = np.asarray(w_oihw, np.float32)
    P, Cin, KH, KW = w_np.shape
    mats = np.zeros((KH, W * Cin, W * P), np.float32)
    for dy in range(KH):
        for dx in range(KW):
            blk = w_np[:, :, dy, dx].T          # (Cin, Cout)
            for wo in range(W):
                wi = wo + dx - 1
                if 0 <= wi < W:
                    mats[dy, wi * Cin:(wi + 1) * Cin, wo * P:(wo + 1) * P] = blk
    return mats


def _diag_mat(wd_oihw, W):
    """1x1 conv (Cout,Cin,1,1) -> (W*Cin, W*Cout) block-diagonal matrix."""
    wd = np.asarray(wd_oihw, np.float32).reshape(wd_oihw.shape[0],
                                                 wd_oihw.shape[1])
    P, Cin = wd.shape
    m = np.zeros((W * Cin, W * P), np.float32)
    for w_ in range(W):
        m[w_ * Cin:(w_ + 1) * Cin, w_ * P:(w_ + 1) * P] = wd.T
    return m


def _group_mat(W, P):
    """(W*P, W*P) with 1 where lane indices share the same channel (i % P)."""
    idx = np.arange(W * P)
    return (idx[:, None] % P == idx[None, :] % P).astype(np.float32)


def _tile_row(v, W):
    return jnp.tile(jnp.asarray(v, jnp.float32), W).reshape(1, -1)


def prepare_srblock_params(params, H, W):
    """Host-side, once per module instance (not per forward)."""
    P, Cin = params["w1"].shape[:2]
    arrs = {
        "w1": jnp.asarray(_band_mats(params["w1"], W), CONV_DTYPE),
        "b1": _tile_row(params["b1"], W),
        "g1": _tile_row(params["g1"], W),
        "be1": _tile_row(params["be1"], W),
        "w2": jnp.asarray(_band_mats(params["w2"], W), CONV_DTYPE),
        "b2": _tile_row(params["b2"], W),
        "g2": _tile_row(params["g2"], W),
        "be2": _tile_row(params["be2"], W),
        "pmat": jnp.asarray(_group_mat(W, P), jnp.float32),
    }
    use_ds = params["wd"] is not None
    if use_ds:
        arrs["wd"] = jnp.asarray(_diag_mat(params["wd"], W), CONV_DTYPE)
        arrs["bd"] = _tile_row(params["bd"], W)
        arrs["gd"] = _tile_row(params["gd"], W)
        arrs["bed"] = _tile_row(params["bed"], W)
    else:
        arrs["wd"] = jnp.zeros((W * Cin, W * P), CONV_DTYPE)
        arrs["bd"] = jnp.zeros((1, W * P), jnp.float32)
        arrs["gd"] = jnp.zeros((1, W * P), jnp.float32)
        arrs["bed"] = jnp.zeros((1, W * P), jnp.float32)
    return {"arrays": arrs, "planes": int(P), "use_ds": bool(use_ds)}


# ------------------------------ forward wrapper --------------------------------
@functools.partial(jax.jit, static_argnames=("planes", "use_ds"))
def _srblock_apply(x_nchw, arrs, *, planes, use_ds):
    N, Cin, H, W = x_nchw.shape
    P = planes
    x = jnp.transpose(x_nchw, (0, 2, 3, 1)).astype(jnp.float32)        # NHWC
    x_flat = x.reshape(N * H, W * Cin)                                 # lane-folded
    x_hpad = jnp.pad(x, ((0, 0), (1, 1), (0, 0), (0, 0))
                     ).reshape(N, H + 2, W * Cin)                      # H-pad only

    kern = functools.partial(_srblock_kernel, N=N, H=H, W=W, Cin=Cin, P=P,
                             use_ds=use_ds)
    out2d = pl.pallas_call(
        kern,
        out_shape=jax.ShapeDtypeStruct((N * H, W * P), jnp.float32),
        scratch_shapes=[pltpu.VMEM((N, H + 2, W * P), jnp.float32)],
    )(x_hpad, x_flat,
      arrs["w1"], arrs["b1"], arrs["g1"], arrs["be1"],
      arrs["w2"], arrs["b2"], arrs["g2"], arrs["be2"],
      arrs["pmat"],
      arrs["wd"], arrs["bd"], arrs["gd"], arrs["bed"])

    out = out2d.reshape(N, H, W, P)
    return jnp.transpose(out, (0, 3, 1, 2))                            # -> NCHW


def srblock_forward(x_nchw, prep):
    return _srblock_apply(x_nchw, prep["arrays"],
                          planes=prep["planes"], use_ds=prep["use_ds"])


# ------------------------- pure-JAX reference (check) --------------------------
def srblock_reference(x, p):
    def conv(x, w, b, pad):
        y = lax.conv_general_dilated(
            x, w, (1, 1), [(pad, pad), (pad, pad)],
            dimension_numbers=("NCHW", "OIHW", "NCHW"),
            precision=lax.Precision.HIGHEST)
        return y + b[None, :, None, None]

    def bn(x, g, be):
        m = jnp.mean(x, axis=(0, 2, 3), keepdims=True)
        v = jnp.mean((x - m) ** 2, axis=(0, 2, 3), keepdims=True)
        return (x - m) / jnp.sqrt(v + BN_EPS) * g[None, :, None, None] + \
            be[None, :, None, None]

    def lrelu(x):
        return jnp.where(x >= 0, x, LEAK * x)

    out = lrelu(bn(conv(x, p["w1"], p["b1"], 1), p["g1"], p["be1"]))
    out = conv(out, p["w2"], p["b2"], 1)
    _, _, h, w = out.shape
    n = w * h - 1
    mu = jnp.mean(out, axis=(2, 3), keepdims=True)
    d = (out - mu) ** 2
    y = d / (4.0 * (jnp.sum(d, axis=(2, 3), keepdims=True) / n + SIMAM_EPS)) + 0.5
    out = out * jax.nn.sigmoid(y)
    out = bn(out, p["g2"], p["be2"])
    if p["wd"] is not None:
        ident = bn(conv(x, p["wd"], p["bd"], 0), p["gd"], p["bed"])
    else:
        ident = x
    return lrelu(out + ident)


# ----------------------------------- main --------------------------------------
if __name__ == "__main__":
    N, Cin, H, W = 2, 4, 16, 16
    planes = 8                          # inplanes != planes -> downsample path

    ks = jax.random.split(jax.random.PRNGKey(0), 13)
    params = {
        "w1": 0.2 * jax.random.normal(ks[0], (planes, Cin, 3, 3), jnp.float32),
        "b1": 0.1 * jax.random.normal(ks[1], (planes,), jnp.float32),
        "g1": 1.0 + 0.1 * jax.random.normal(ks[2], (planes,), jnp.float32),
        "be1": 0.1 * jax.random.normal(ks[3], (planes,), jnp.float32),
        "w2": 0.2 * jax.random.normal(ks[4], (planes, planes, 3, 3), jnp.float32),
        "b2": 0.1 * jax.random.normal(ks[5], (planes,), jnp.float32),
        "g2": 1.0 + 0.1 * jax.random.normal(ks[6], (planes,), jnp.float32),
        "be2": 0.1 * jax.random.normal(ks[7], (planes,), jnp.float32),
        "wd": 0.2 * jax.random.normal(ks[8], (planes, Cin, 1, 1), jnp.float32),
        "bd": 0.1 * jax.random.normal(ks[9], (planes,), jnp.float32),
        "gd": 1.0 + 0.1 * jax.random.normal(ks[10], (planes,), jnp.float32),
        "bed": 0.1 * jax.random.normal(ks[11], (planes,), jnp.float32),
    }
    x = jax.random.normal(ks[12], (N, Cin, H, W), jnp.float32)

    prep = prepare_srblock_params(params, H, W)          # one-time preprocessing
    out = jax.block_until_ready(srblock_forward(x, prep))
    ref = srblock_reference(x, params)

    assert out.shape == (N, planes, H, W), out.shape
    # bf16 matmul operands (f32 accumulation) -> slightly looser tolerance
    # than a pure-f32 implementation.
    max_err = float(jnp.max(jnp.abs(out - ref)))
    if not bool(jnp.allclose(out, ref, atol=5e-2, rtol=5e-2)):
        raise SystemExit(f"mismatch: max abs err = {max_err}")
    print("KERNEL_OK")
</pallas_src>

<mosaic_0001>
module attributes {stable_mosaic.version = 11 : i64} {
  func.func @_srblock_kernel(%arg0: memref<2x18x64xf32, #tpu.memory_space<vmem>>, %arg1: memref<32x64xf32, #tpu.memory_space<vmem>>, %arg2: memref<3x64x128xbf16, #tpu.memory_space<vmem>>, %arg3: memref<1x128xf32, #tpu.memory_space<vmem>>, %arg4: memref<1x128xf32, #tpu.memory_space<vmem>>, %arg5: memref<1x128xf32, #tpu.memory_space<vmem>>, %arg6: memref<3x128x128xbf16, #tpu.memory_space<vmem>>, %arg7: memref<1x128xf32, #tpu.memory_space<vmem>>, %arg8: memref<1x128xf32, #tpu.memory_space<vmem>>, %arg9: memref<1x128xf32, #tpu.memory_space<vmem>>, %arg10: memref<128x128xf32, #tpu.memory_space<vmem>>, %arg11: memref<64x128xbf16, #tpu.memory_space<vmem>>, %arg12: memref<1x128xf32, #tpu.memory_space<vmem>>, %arg13: memref<1x128xf32, #tpu.memory_space<vmem>>, %arg14: memref<1x128xf32, #tpu.memory_space<vmem>>, %arg15: memref<32x128xf32, #tpu.memory_space<vmem>>, %arg16: memref<2x18x128xf32, #tpu.memory_space<vmem>>) attributes {dimension_semantics = [], scalar_prefetch = 0 : i64, scratch_operands = 1 : i64, tpu.core_type = #tpu.core_type<tc>} {
    %c0 = arith.constant 0 : index
    %c0_0 = arith.constant 0 : index
    %0 = vector.load %arg10[%c0, %c0_0] : memref<128x128xf32, #tpu.memory_space<vmem>>, vector<128x128xf32>
    %c0_1 = arith.constant 0 : index
    %c0_2 = arith.constant 0 : index
    %1 = vector.load %arg3[%c0_1, %c0_2] : memref<1x128xf32, #tpu.memory_space<vmem>>, vector<1x128xf32>
    %c0_3 = arith.constant 0 : index
    %c0_4 = arith.constant 0 : index
    %c0_5 = arith.constant 0 : index
    %2 = vector.load %arg0[%c0_3, %c0_4, %c0_5] : memref<2x18x64xf32, #tpu.memory_space<vmem>>, vector<2x16x64xf32>
    %3 = vector.shape_cast %2 : vector<2x16x64xf32> to vector<32x64xf32>
    %4 = arith.truncf %3 : vector<32x64xf32> to vector<32x64xbf16>
    %c0_6 = arith.constant 0 : index
    %c0_7 = arith.constant 0 : index
    %c0_8 = arith.constant 0 : index
    %5 = vector.load %arg2[%c0_6, %c0_7, %c0_8] : memref<3x64x128xbf16, #tpu.memory_space<vmem>>, vector<1x64x128xbf16>
    %6 = vector.shape_cast %5 : vector<1x64x128xbf16> to vector<64x128xbf16>
    %cst = arith.constant dense<0.000000e+00> : vector<32x128xf32>
    %7 = tpu.matmul %4, %6, %cst {dimension_numbers = #tpu.dot_dimension_numbers<[1], [0], [0], [1], [0, 0, 1, 1], [], []>} : vector<32x64xbf16>, vector<64x128xbf16>, vector<32x128xf32> -> vector<32x128xf32>
    %8 = vector.broadcast %1 : vector<1x128xf32> to vector<32x128xf32>
    %9 = arith.addf %8, %7 : vector<32x128xf32>
    %c0_9 = arith.constant 0 : index
    %c1 = arith.constant 1 : index
    %c0_10 = arith.constant 0 : index
    %10 = vector.load %arg0[%c0_9, %c1, %c0_10] : memref<2x18x64xf32, #tpu.memory_space<vmem>>, vector<2x16x64xf32>
    %11 = vector.shape_cast %10 : vector<2x16x64xf32> to vector<32x64xf32>
    %12 = arith.truncf %11 : vector<32x64xf32> to vector<32x64xbf16>
    %c1_11 = arith.constant 1 : index
    %c0_12 = arith.constant 0 : index
    %c0_13 = arith.constant 0 : index
    %13 = vector.load %arg2[%c1_11, %c0_12, %c0_13] : memref<3x64x128xbf16, #tpu.memory_space<vmem>>, vector<1x64x128xbf16>
    %14 = vector.shape_cast %13 : vector<1x64x128xbf16> to vector<64x128xbf16>
    %cst_14 = arith.constant dense<0.000000e+00> : vector<32x128xf32>
    %15 = tpu.matmul %12, %14, %cst_14 {dimension_numbers = #tpu.dot_dimension_numbers<[1], [0], [0], [1], [0, 0, 1, 1], [], []>} : vector<32x64xbf16>, vector<64x128xbf16>, vector<32x128xf32> -> vector<32x128xf32>
    %16 = arith.addf %9, %15 : vector<32x128xf32>
    %c0_15 = arith.constant 0 : index
    %c2 = arith.constant 2 : index
    %c0_16 = arith.constant 0 : index
    %17 = vector.load %arg0[%c0_15, %c2, %c0_16] : memref<2x18x64xf32, #tpu.memory_space<vmem>>, vector<2x16x64xf32>
    %18 = vector.shape_cast %17 : vector<2x16x64xf32> to vector<32x64xf32>
    %19 = arith.truncf %18 : vector<32x64xf32> to vector<32x64xbf16>
    %c2_17 = arith.constant 2 : index
    %c0_18 = arith.constant 0 : index
    %c0_19 = arith.constant 0 : index
    %20 = vector.load %arg2[%c2_17, %c0_18, %c0_19] : memref<3x64x128xbf16, #tpu.memory_space<vmem>>, vector<1x64x128xbf16>
    %21 = vector.shape_cast %20 : vector<1x64x128xbf16> to vector<64x128xbf16>
    %cst_20 = arith.constant dense<0.000000e+00> : vector<32x128xf32>
    %22 = tpu.matmul %19, %21, %cst_20 {dimension_numbers = #tpu.dot_dimension_numbers<[1], [0], [0], [1], [0, 0, 1, 1], [], []>} : vector<32x64xbf16>, vector<64x128xbf16>, vector<32x128xf32> -> vector<32x128xf32>
    %23 = arith.addf %16, %22 : vector<32x128xf32>
    %c0_21 = arith.constant 0 : index
    %c0_22 = arith.constant 0 : index
    %24 = vector.load %arg4[%c0_21, %c0_22] : memref<1x128xf32, #tpu.memory_space<vmem>>, vector<1x128xf32>
    %c0_23 = arith.constant 0 : index
    %c0_24 = arith.constant 0 : index
    %25 = vector.load %arg5[%c0_23, %c0_24] : memref<1x128xf32, #tpu.memory_space<vmem>>, vector<1x128xf32>
    %cst_25 = arith.constant dense<0.000000e+00> : vector<128xf32>
    %26 = vector.multi_reduction <add>, %23, %cst_25 [0] : vector<32x128xf32> to vector<128xf32>
    %27 = vector.shape_cast %26 : vector<128xf32> to vector<1x128xf32>
    %cst_26 = arith.constant dense<0.000000e+00> : vector<1x128xf32>
    %28 = tpu.matmul %27, %0, %cst_26 {dimension_numbers = #tpu.dot_dimension_numbers<[1], [0], [0], [1], [0, 0, 1, 1], [], []>} : vector<1x128xf32>, vector<128x128xf32>, vector<1x128xf32> -> vector<1x128xf32>
    %cst_27 = arith.constant 0.001953125 : f32
    %29 = vector.broadcast %cst_27 : f32 to vector<1x128xf32>
    %30 = arith.mulf %28, %29 : vector<1x128xf32>
    %31 = vector.broadcast %30 : vector<1x128xf32> to vector<32x128xf32>
    %32 = arith.subf %23, %31 : vector<32x128xf32>
    %33 = arith.mulf %32, %32 : vector<32x128xf32>
    %cst_28 = arith.constant dense<0.000000e+00> : vector<128xf32>
    %34 = vector.multi_reduction <add>, %33, %cst_28 [0] : vector<32x128xf32> to vector<128xf32>
    %35 = vector.shape_cast %34 : vector<128xf32> to vector<1x128xf32>
    %cst_29 = arith.constant dense<0.000000e+00> : vector<1x128xf32>
    %36 = tpu.matmul %35, %0, %cst_29 {dimension_numbers = #tpu.dot_dimension_numbers<[1], [0], [0], [1], [0, 0, 1, 1], [], []>} : vector<1x128xf32>, vector<128x128xf32>, vector<1x128xf32> -> vector<1x128xf32>
    %cst_30 = arith.constant 0.001953125 : f32
    %37 = vector.broadcast %cst_30 : f32 to vector<1x128xf32>
    %38 = arith.mulf %36, %37 : vector<1x128xf32>
    %cst_31 = arith.constant 9.99999974E-6 : f32
    %39 = vector.broadcast %cst_31 : f32 to vector<1x128xf32>
    %40 = arith.addf %38, %39 : vector<1x128xf32>
    %41 = math.rsqrt %40 : vector<1x128xf32>
    %42 = arith.mulf %24, %41 : vector<1x128xf32>
    %43 = vector.broadcast %42 : vector<1x128xf32> to vector<32x128xf32>
    %44 = arith.mulf %32, %43 : vector<32x128xf32>
    %45 = vector.broadcast %25 : vector<1x128xf32> to vector<32x128xf32>
    %46 = arith.addf %44, %45 : vector<32x128xf32>
    %cst_32 = arith.constant 0.000000e+00 : f32
    %47 = vector.broadcast %cst_32 : f32 to vector<32x128xf32>
    %48 = arith.cmpf oge, %46, %47 : vector<32x128xf32>
    %cst_33 = arith.constant 1.000000e-01 : f32
    %49 = vector.broadcast %cst_33 : f32 to vector<32x128xf32>
    %50 = arith.mulf %49, %46 : vector<32x128xf32>
    %51 = arith.select %48, %46, %50 : vector<32x128xi1>, vector<32x128xf32>
    %cst_34 = arith.constant 0.000000e+00 : f32
    %52 = vector.broadcast %cst_34 : f32 to vector<2x1x128xf32>
    %c0_35 = arith.constant 0 : index
    %c0_36 = arith.constant 0 : index
    %c0_37 = arith.constant 0 : index
    %53 = vector.load %arg16[%c0_35, %c0_36, %c0_37] : memref<2x18x128xf32, #tpu.memory_space<vmem>>, vector<2x1x128xf32>
    tpu.vector_store %arg16[%c0_35, %c0_36, %c0_37], %52 {strides = array<i32>} : memref<2x18x128xf32, #tpu.memory_space<vmem>>, vector<2x1x128xf32>,
    %cst_38 = arith.constant 0.000000e+00 : f32
    %54 = vector.broadcast %cst_38 : f32 to vector<2x1x128xf32>
    %c0_39 = arith.constant 0 : index
    %c17 = arith.constant 17 : index
    %c0_40 = arith.constant 0 : index
    %55 = vector.load %arg16[%c0_39, %c17, %c0_40] : memref<2x18x128xf32, #tpu.memory_space<vmem>>, vector<2x1x128xf32>
    tpu.vector_store %arg16[%c0_39, %c17, %c0_40], %54 {strides = array<i32>} : memref<2x18x128xf32, #tpu.memory_space<vmem>>, vector<2x1x128xf32>,
    %56 = vector.shape_cast %51 : vector<32x128xf32> to vector<2x16x128xf32>
    %c0_41 = arith.constant 0 : index
    %c1_42 = arith.constant 1 : index
    %c0_43 = arith.constant 0 : index
    %57 = vector.load %arg16[%c0_41, %c1_42, %c0_43] : memref<2x18x128xf32, #tpu.memory_space<vmem>>, vector<2x16x128xf32>
    tpu.vector_store %arg16[%c0_41, %c1_42, %c0_43], %56 {strides = array<i32>} : memref<2x18x128xf32, #tpu.memory_space<vmem>>, vector<2x16x128xf32>,
    %c0_44 = arith.constant 0 : index
    %c0_45 = arith.constant 0 : index
    %58 = vector.load %arg7[%c0_44, %c0_45] : memref<1x128xf32, #tpu.memory_space<vmem>>, vector<1x128xf32>
    %c0_46 = arith.constant 0 : index
    %c0_47 = arith.constant 0 : index
    %c0_48 = arith.constant 0 : index
    %59 = vector.load %arg16[%c0_46, %c0_47, %c0_48] : memref<2x18x128xf32, #tpu.memory_space<vmem>>, vector<2x16x128xf32>
    %60 = vector.shape_cast %59 : vector<2x16x128xf32> to vector<32x128xf32>
    %61 = arith.truncf %60 : vector<32x128xf32> to vector<32x128xbf16>
    %c0_49 = arith.constant 0 : index
    %c0_50 = arith.constant 0 : index
    %c0_51 = arith.constant 0 : index
    %62 = vector.load %arg6[%c0_49, %c0_50, %c0_51] : memref<3x128x128xbf16, #tpu.memory_space<vmem>>, vector<1x128x128xbf16>
    %63 = vector.shape_cast %62 : vector<1x128x128xbf16> to vector<128x128xbf16>
    %cst_52 = arith.constant dense<0.000000e+00> : vector<32x128xf32>
    %64 = tpu.matmul %61, %63, %cst_52 {dimension_numbers = #tpu.dot_dimension_numbers<[1], [0], [0], [1], [0, 0, 1, 1], [], []>} : vector<32x128xbf16>, vector<128x128xbf16>, vector<32x128xf32> -> vector<32x128xf32>
    %65 = vector.broadcast %58 : vector<1x128xf32> to vector<32x128xf32>
    %66 = arith.addf %65, %64 : vector<32x128xf32>
    %c0_53 = arith.constant 0 : index
    %c1_54 = arith.constant 1 : index
    %c0_55 = arith.constant 0 : index
    %67 = vector.load %arg16[%c0_53, %c1_54, %c0_55] : memref<2x18x128xf32, #tpu.memory_space<vmem>>, vector<2x16x128xf32>
    %68 = vector.shape_cast %67 : vector<2x16x128xf32> to vector<32x128xf32>
    %69 = arith.truncf %68 : vector<32x128xf32> to vector<32x128xbf16>
    %c1_56 = arith.constant 1 : index
    %c0_57 = arith.constant 0 : index
    %c0_58 = arith.constant 0 : index
    %70 = vector.load %arg6[%c1_56, %c0_57, %c0_58] : memref<3x128x128xbf16, #tpu.memory_space<vmem>>, vector<1x128x128xbf16>
    %71 = vector.shape_cast %70 : vector<1x128x128xbf16> to vector<128x128xbf16>
    %cst_59 = arith.constant dense<0.000000e+00> : vector<32x128xf32>
    %72 = tpu.matmul %69, %71, %cst_59 {dimension_numbers = #tpu.dot_dimension_numbers<[1], [0], [0], [1], [0, 0, 1, 1], [], []>} : vector<32x128xbf16>, vector<128x128xbf16>, vector<32x128xf32> -> vector<32x128xf32>
    %73 = arith.addf %66, %72 : vector<32x128xf32>
    %c0_60 = arith.constant 0 : index
    %c2_61 = arith.constant 2 : index
    %c0_62 = arith.constant 0 : index
    %74 = vector.load %arg16[%c0_60, %c2_61, %c0_62] : memref<2x18x128xf32, #tpu.memory_space<vmem>>, vector<2x16x128xf32>
    %75 = vector.shape_cast %74 : vector<2x16x128xf32> to vector<32x128xf32>
    %76 = arith.truncf %75 : vector<32x128xf32> to vector<32x128xbf16>
    %c2_63 = arith.constant 2 : index
    %c0_64 = arith.constant 0 : index
    %c0_65 = arith.constant 0 : index
    %77 = vector.load %arg6[%c2_63, %c0_64, %c0_65] : memref<3x128x128xbf16, #tpu.memory_space<vmem>>, vector<1x128x128xbf16>
    %78 = vector.shape_cast %77 : vector<1x128x128xbf16> to vector<128x128xbf16>
    %cst_66 = arith.constant dense<0.000000e+00> : vector<32x128xf32>
    %79 = tpu.matmul %76, %78, %cst_66 {dimension_numbers = #tpu.dot_dimension_numbers<[1], [0], [0], [1], [0, 0, 1, 1], [], []>} : vector<32x128xbf16>, vector<128x128xbf16>, vector<32x128xf32> -> vector<32x128xf32>
    %80 = arith.addf %73, %79 : vector<32x128xf32>
    %81 = vector.shape_cast %80 : vector<32x128xf32> to vector<2x16x128xf32>
    %cst_67 = arith.constant dense<0.000000e+00> : vector<2x128xf32>
    %82 = vector.multi_reduction <add>, %81, %cst_67 [1] : vector<2x16x128xf32> to vector<2x128xf32>
    %cst_68 = arith.constant dense<0.000000e+00> : vector<2x128xf32>
    %83 = tpu.matmul %82, %0, %cst_68 {dimension_numbers = #tpu.dot_dimension_numbers<[1], [0], [0], [1], [0, 0, 1, 1], [], []>} : vector<2x128xf32>, vector<128x128xf32>, vector<2x128xf32> -> vector<2x128xf32>
    %cst_69 = arith.constant 2.560000e+02 : f32
    %84 = vector.broadcast %cst_69 : f32 to vector<2x128xf32>
    %85 = arith.divf %83, %84 : vector<2x128xf32>
    %86 = vector.shape_cast %85 : vector<2x128xf32> to vector<2x1x128xf32>
    %87 = vector.broadcast %86 : vector<2x1x128xf32> to vector<2x16x128xf32>
    %88 = arith.subf %81, %87 : vector<2x16x128xf32>
    %89 = arith.mulf %88, %88 : vector<2x16x128xf32>
    %cst_70 = arith.constant dense<0.000000e+00> : vector<2x128xf32>
    %90 = vector.multi_reduction <add>, %89, %cst_70 [1] : vector<2x16x128xf32> to vector<2x128xf32>
    %cst_71 = arith.constant dense<0.000000e+00> : vector<2x128xf32>
    %91 = tpu.matmul %90, %0, %cst_71 {dimension_numbers = #tpu.dot_dimension_numbers<[1], [0], [0], [1], [0, 0, 1, 1], [], []>} : vector<2x128xf32>, vector<128x128xf32>, vector<2x128xf32> -> vector<2x128xf32>
    %92 = vector.shape_cast %91 : vector<2x128xf32> to vector<2x1x128xf32>
    %cst_72 = arith.constant 2.550000e+02 : f32
    %93 = vector.broadcast %cst_72 : f32 to vector<2x1x128xf32>
    %94 = arith.divf %92, %93 : vector<2x1x128xf32>
    %cst_73 = arith.constant 9.99999974E-5 : f32
    %95 = vector.broadcast %cst_73 : f32 to vector<2x1x128xf32>
    %96 = arith.addf %94, %95 : vector<2x1x128xf32>
    %cst_74 = arith.constant 4.000000e+00 : f32
    %97 = vector.broadcast %cst_74 : f32 to vector<2x1x128xf32>
    %98 = arith.mulf %97, %96 : vector<2x1x128xf32>
    %99 = vector.broadcast %98 : vector<2x1x128xf32> to vector<2x16x128xf32>
    %100 = arith.divf %89, %99 : vector<2x16x128xf32>
    %cst_75 = arith.constant 5.000000e-01 : f32
    %101 = vector.broadcast %cst_75 : f32 to vector<2x16x128xf32>
    %102 = arith.addf %100, %101 : vector<2x16x128xf32>
    %103 = arith.negf %102 : vector<2x16x128xf32>
    %104 = math.exp %103 : vector<2x16x128xf32>
    %cst_76 = arith.constant 1.000000e+00 : f32
    %105 = vector.broadcast %cst_76 : f32 to vector<2x16x128xf32>
    %106 = arith.addf %105, %104 : vector<2x16x128xf32>
    %107 = arith.divf %105, %106 : vector<2x16x128xf32>
    %108 = arith.mulf %81, %107 : vector<2x16x128xf32>
    %109 = vector.shape_cast %108 : vector<2x16x128xf32> to vector<32x128xf32>
    %c0_77 = arith.constant 0 : index
    %c0_78 = arith.constant 0 : index
    %110 = vector.load %arg8[%c0_77, %c0_78] : memref<1x128xf32, #tpu.memory_space<vmem>>, vector<1x128xf32>
    %c0_79 = arith.constant 0 : index
    %c0_80 = arith.constant 0 : index
    %111 = vector.load %arg9[%c0_79, %c0_80] : memref<1x128xf32, #tpu.memory_space<vmem>>, vector<1x128xf32>
    %cst_81 = arith.constant dense<0.000000e+00> : vector<128xf32>
    %112 = vector.multi_reduction <add>, %109, %cst_81 [0] : vector<32x128xf32> to vector<128xf32>
    %113 = vector.shape_cast %112 : vector<128xf32> to vector<1x128xf32>
    %cst_82 = arith.constant dense<0.000000e+00> : vector<1x128xf32>
    %114 = tpu.matmul %113, %0, %cst_82 {dimension_numbers = #tpu.dot_dimension_numbers<[1], [0], [0], [1], [0, 0, 1, 1], [], []>} : vector<1x128xf32>, vector<128x128xf32>, vector<1x128xf32> -> vector<1x128xf32>
    %cst_83 = arith.constant 0.001953125 : f32
    %115 = vector.broadcast %cst_83 : f32 to vector<1x128xf32>
    %116 = arith.mulf %114, %115 : vector<1x128xf32>
    %117 = vector.broadcast %116 : vector<1x128xf32> to vector<32x128xf32>
    %118 = arith.subf %109, %117 : vector<32x128xf32>
    %119 = arith.mulf %118, %118 : vector<32x128xf32>
    %cst_84 = arith.constant dense<0.000000e+00> : vector<128xf32>
    %120 = vector.multi_reduction <add>, %119, %cst_84 [0] : vector<32x128xf32> to vector<128xf32>
    %121 = vector.shape_cast %120 : vector<128xf32> to vector<1x128xf32>
    %cst_85 = arith.constant dense<0.000000e+00> : vector<1x128xf32>
    %122 = tpu.matmul %121, %0, %cst_85 {dimension_numbers = #tpu.dot_dimension_numbers<[1], [0], [0], [1], [0, 0, 1, 1], [], []>} : vector<1x128xf32>, vector<128x128xf32>, vector<1x128xf32> -> vector<1x128xf32>
    %cst_86 = arith.constant 0.001953125 : f32
    %123 = vector.broadcast %cst_86 : f32 to vector<1x128xf32>
    %124 = arith.mulf %122, %123 : vector<1x128xf32>
    %cst_87 = arith.constant 9.99999974E-6 : f32
    %125 = vector.broadcast %cst_87 : f32 to vector<1x128xf32>
    %126 = arith.addf %124, %125 : vector<1x128xf32>
    %127 = math.rsqrt %126 : vector<1x128xf32>
    %128 = arith.mulf %110, %127 : vector<1x128xf32>
    %129 = vector.broadcast %128 : vector<1x128xf32> to vector<32x128xf32>
    %130 = arith.mulf %118, %129 : vector<32x128xf32>
    %131 = vector.broadcast %111 : vector<1x128xf32> to vector<32x128xf32>
    %132 = arith.addf %130, %131 : vector<32x128xf32>
    %c0_88 = arith.constant 0 : index
    %c0_89 = arith.constant 0 : index
    %133 = vector.load %arg1[%c0_88, %c0_89] : memref<32x64xf32, #tpu.memory_space<vmem>>, vector<32x64xf32>
    %134 = arith.truncf %133 : vector<32x64xf32> to vector<32x64xbf16>
    %c0_90 = arith.constant 0 : index
    %c0_91 = arith.constant 0 : index
    %135 = vector.load %arg11[%c0_90, %c0_91] : memref<64x128xbf16, #tpu.memory_space<vmem>>, vector<64x128xbf16>
    %cst_92 = arith.constant dense<0.000000e+00> : vector<32x128xf32>
    %136 = tpu.matmul %134, %135, %cst_92 {dimension_numbers = #tpu.dot_dimension_numbers<[1], [0], [0], [1], [0, 0, 1, 1], [], []>} : vector<32x64xbf16>, vector<64x128xbf16>, vector<32x128xf32> -> vector<32x128xf32>
    %c0_93 = arith.constant 0 : index
    %c0_94 = arith.constant 0 : index
    %137 = vector.load %arg12[%c0_93, %c0_94] : memref<1x128xf32, #tpu.memory_space<vmem>>, vector<1x128xf32>
    %138 = vector.broadcast %137 : vector<1x128xf32> to vector<32x128xf32>
    %139 = arith.addf %136, %138 : vector<32x128xf32>
    %c0_95 = arith.constant 0 : index
    %c0_96 = arith.constant 0 : index
    %140 = vector.load %arg13[%c0_95, %c0_96] : memref<1x128xf32, #tpu.memory_space<vmem>>, vector<1x128xf32>
    %c0_97 = arith.constant 0 : index
    %c0_98 = arith.constant 0 : index
    %141 = vector.load %arg14[%c0_97, %c0_98] : memref<1x128xf32, #tpu.memory_space<vmem>>, vector<1x128xf32>
    %cst_99 = arith.constant dense<0.000000e+00> : vector<128xf32>
    %142 = vector.multi_reduction <add>, %139, %cst_99 [0] : vector<32x128xf32> to vector<128xf32>
    %143 = vector.shape_cast %142 : vector<128xf32> to vector<1x128xf32>
    %cst_100 = arith.constant dense<0.000000e+00> : vector<1x128xf32>
    %144 = tpu.matmul %143, %0, %cst_100 {dimension_numbers = #tpu.dot_dimension_numbers<[1], [0], [0], [1], [0, 0, 1, 1], [], []>} : vector<1x128xf32>, vector<128x128xf32>, vector<1x128xf32> -> vector<1x128xf32>
    %cst_101 = arith.constant 0.001953125 : f32
    %145 = vector.broadcast %cst_101 : f32 to vector<1x128xf32>
    %146 = arith.mulf %144, %145 : vector<1x128xf32>
    %147 = vector.broadcast %146 : vector<1x128xf32> to vector<32x128xf32>
    %148 = arith.subf %139, %147 : vector<32x128xf32>
    %149 = arith.mulf %148, %148 : vector<32x128xf32>
    %cst_102 = arith.constant dense<0.000000e+00> : vector<128xf32>
    %150 = vector.multi_reduction <add>, %149, %cst_102 [0] : vector<32x128xf32> to vector<128xf32>
    %151 = vector.shape_cast %150 : vector<128xf32> to vector<1x128xf32>
    %cst_103 = arith.constant dense<0.000000e+00> : vector<1x128xf32>
    %152 = tpu.matmul %151, %0, %cst_103 {dimension_numbers = #tpu.dot_dimension_numbers<[1], [0], [0], [1], [0, 0, 1, 1], [], []>} : vector<1x128xf32>, vector<128x128xf32>, vector<1x128xf32> -> vector<1x128xf32>
    %cst_104 = arith.constant 0.001953125 : f32
    %153 = vector.broadcast %cst_104 : f32 to vector<1x128xf32>
    %154 = arith.mulf %152, %153 : vector<1x128xf32>
    %cst_105 = arith.constant 9.99999974E-6 : f32
    %155 = vector.broadcast %cst_105 : f32 to vector<1x128xf32>
    %156 = arith.addf %154, %155 : vector<1x128xf32>
    %157 = math.rsqrt %156 : vector<1x128xf32>
    %158 = arith.mulf %140, %157 : vector<1x128xf32>
    %159 = vector.broadcast %158 : vector<1x128xf32> to vector<32x128xf32>
    %160 = arith.mulf %148, %159 : vector<32x128xf32>
    %161 = vector.broadcast %141 : vector<1x128xf32> to vector<32x128xf32>
    %162 = arith.addf %160, %161 : vector<32x128xf32>
    %163 = arith.addf %132, %162 : vector<32x128xf32>
    %cst_106 = arith.constant 0.000000e+00 : f32
    %164 = vector.broadcast %cst_106 : f32 to vector<32x128xf32>
    %165 = arith.cmpf oge, %163, %164 : vector<32x128xf32>
    %cst_107 = arith.constant 1.000000e-01 : f32
    %166 = vector.broadcast %cst_107 : f32 to vector<32x128xf32>
    %167 = arith.mulf %166, %163 : vector<32x128xf32>
    %168 = arith.select %165, %163, %167 : vector<32x128xi1>, vector<32x128xf32>
    %c0_108 = arith.constant 0 : index
    %c0_109 = arith.constant 0 : index
    %169 = vector.load %arg15[%c0_108, %c0_109] : memref<32x128xf32, #tpu.memory_space<vmem>>, vector<32x128xf32>
    tpu.vector_store %arg15[%c0_108, %c0_109], %168 {strides = array<i32>} : memref<32x128xf32, #tpu.memory_space<vmem>>, vector<32x128xf32>,
    return
  }
}

</mosaic_0001>

<bundles_post_ra>
// kernel: _srblock_apply.1
= control target key start
LH: loop header
LB: loop body
LE: loop exit
PB: predicated region body
PF: predicated region fallthrough
CT: control target
= control target key end

     0   :  { %v2753_v1 = vmov 0.0|0.0   ;;  %vm106_vm0 = vcmask 523264   ;;  %vm2754_vm1 = vmmov 0   ;;  %v2755_v52 = vmov 0.0   ;;  %s3346_s2 = inlined_call_operand.vmem [shape: bf16[3,64,128], index: 2, kind: input, shape index: {}]   ;;  %s3347_s0 = inlined_call_operand.vmem [shape: f32[2,18,64], index: 0, kind: input, shape index: {}]   ;;  %s3348_s10 = inlined_call_operand.vmem [shape: f32[128,128], index: 10, kind: input, shape index: {}]   ;;  %s3349_s3 = inlined_call_operand.vmem [shape: f32[1,128], index: 3, kind: input, shape index: {}]   ;;  %s3350_s6 = inlined_call_operand.vmem [shape: bf16[3,128,128], index: 6, kind: input, shape index: {}]   ;;  %s3351_s4 = inlined_call_operand.vmem [shape: f32[1,128], index: 4, kind: input, shape index: {}]   ;;  %s3352_s5 = inlined_call_operand.vmem [shape: f32[1,128], index: 5, kind: input, shape index: {}]   ;;  %s3353_s7 = inlined_call_operand.vmem [shape: f32[1,128], index: 7, kind: input, shape index: {}]   ;;  %s3354_s11 = inlined_call_operand.vmem [shape: bf16[64,128], index: 11, kind: input, shape index: {}]   ;;  %s3355_s1 = inlined_call_operand.vmem [shape: f32[32,64], index: 1, kind: input, shape index: {}]   ;;  %s3356_s12 = inlined_call_operand.vmem [shape: f32[1,128], index: 12, kind: input, shape index: {}]   ;;  %s3357_s8 = inlined_call_operand.vmem [shape: f32[1,128], index: 8, kind: input, shape index: {}]   ;;  %s3358_s13 = inlined_call_operand.vmem [shape: f32[1,128], index: 13, kind: input, shape index: {}]   ;;  %s3359_s9 = inlined_call_operand.vmem [shape: f32[1,128], index: 9, kind: input, shape index: {}]   ;;  %s3360_s14 = inlined_call_operand.vmem [shape: f32[1,128], index: 14, kind: input, shape index: {}]   ;;  %s3361_s15 = inlined_call_operand.vmem [shape: f32[32,128], index: 15, kind: output, shape index: {}]  }
   0x1   :  { %v2687_v0 = vld [vmem:[%s3346_s2] sm:$0xff]   ;;  %2467 = vmatprep.subr.bf16.mxu1 %v2753_v1  ;;  %v2688_v2 = vld [vmem:[%s3346_s2 + $0x8] sm:$0xff]   ;;  %v2689_v3 = vld [vmem:[%s3346_s2 + $0x10] sm:$0xff]   ;;  %2147 = vmatprep.mubr.msk.f32.mxu1 %vm2754_vm1, %v2755_v52  ;;  %577 = vst [vmem:[#allocation2] sm:$0x1] %v2755_v52  ;;  %vm979_vm6 = vcmask 1041409  }
   0x2   :  { %2079 = vmatprep.subr.bf16.mxu0 %v2687_v0  ;;  %v68_v4 = vld [vmem:[%s3347_s0] sm:$0xff]  ;;  %v69_v5 = vld [vmem:[%s3347_s0 + $0x8] sm:$0xff]  ;;  %v2690_v7 = vld [vmem:[%s3346_s2 + $0x18] sm:$0xff]   ;;  %578 = vst [vmem:[#allocation2 + $0x18] sm:$0x1] %v2755_v52 }
   0x3   :  { %2080 = vmatpush3.bf16.msra.mxu0 %v2687_v0  ;;  %v72_v6 = vpack.c.bf16 %v69_v5, %v68_v4  ;;  %v2691_v8 = vld [vmem:[%s3346_s2 + $0x20] sm:$0xff]   ;;  %v70_v9 = vld [vmem:[%s3347_s0 + $0x18] sm:$0xff]  ;;  %v173_v12 = vld [vmem:[%s3347_s0 + $0x9] sm:$0xff]  ;;  %579 = vst [vmem:[#allocation2 + $0x11] sm:$0x1] %v2755_v52 }
   0x4   :  { %2081 = vmatprep.subr.bf16.mxu0 %v2688_v2  ;;  %v71_v10 = vld [vmem:[%s3347_s0 + $0x20] sm:$0xff]  ;;  %v2692_v15 = vld [vmem:[%s3346_s2 + $0x28] sm:$0xff]   ;;  %v53_v19 = vld [vmem:[%s3348_s10 + $0x10] sm:$0xff]  ;;  %580 = vst [vmem:[#allocation2 + $0x29] sm:$0x1] %v2755_v52 }
   0x5   :  { %2087 = vmatprep.mubr.msk.bf16.mxu0 %vm106_vm0, %v72_v6  ;;  %v172_v11 = vld [vmem:[%s3347_s0 + $0x1] sm:$0xff]  ;;  %v73_v13 = vpack.c.bf16 %v71_v10, %v70_v9  ;;  %v54_v20 = vld [vmem:[%s3348_s10 + $0x18] sm:$0xff]  ;;  %v2693_v21 = vld [vmem:[%s3346_s2 + $0x30] sm:$0xff]  }
   0x6   :  { %v176_v14 = vpack.c.bf16 %v173_v12, %v172_v11  ;;  %v51_v16 = vld [vmem:[%s3348_s10] sm:$0xff]  ;;  %v52_v17 = vld [vmem:[%s3348_s10 + $0x8] sm:$0xff]  ;;  %v2895_v22 = vpack.c.bf16 %v54_v20, %v53_v19  ;;  %v2694_v23 = vld [vmem:[%s3346_s2 + $0x38] sm:$0xff]   ;;  %v450_v11 = vlaneseq }
   0x7   :  { %2082 = vmatpush3.bf16.msra.mxu0 %v2688_v2  ;;  %v2881_v18 = vpack.c.bf16 %v52_v17, %v51_v16  ;;  %v174_v24 = vld [vmem:[%s3347_s0 + $0x19] sm:$0xff]  ;;  %v175_v25 = vld [vmem:[%s3347_s0 + $0x21] sm:$0xff]  ;;  %v271_v28 = vld [vmem:[%s3347_s0 + $0xa] sm:$0xff] }
   0x8   :  { %2083 = vmatprep.subr.bf16.mxu0 %v2689_v3  ;;  %v2695_v26 = vld [vmem:[%s3346_s2 + $0x40] sm:$0xff]   ;;  %v177_v29 = vpack.c.bf16 %v175_v25, %v174_v24  ;;  %v2696_v31 = vld [vmem:[%s3346_s2 + $0x48] sm:$0xff]   ;;  %v2697_v32 = vld [vmem:[%s3346_s2 + $0x50] sm:$0xff]   ;;  %v3023_v12 = vshrl.u32 %v450_v11, 7 }
   0x9   :  { %2469 = vmatpush3.bf16.msra.mxu1 %v2881_v18  ;;  %v270_v27 = vld [vmem:[%s3347_s0 + $0x2] sm:$0xff]  ;;  %v2698_v33 = vld [vmem:[%s3346_s2 + $0x58] sm:$0xff]   ;;  %v57_v40 = vld [vmem:[%s3348_s10 + $0x30] sm:$0xff] }
   0xa   :  { %2470 = vmatprep.subr.bf16.mxu1 %v2753_v1  ;;  %v274_v30 = vpack.c.bf16 %v271_v28, %v270_v27  ;;  %v272_v34 = vld [vmem:[%s3347_s0 + $0x1a] sm:$0xff]  ;;  %v273_v35 = vld [vmem:[%s3347_s0 + $0x22] sm:$0xff]  ;;  %v61_v46 = vld [vmem:[%s3348_s10 + $0x50] sm:$0xff] }
   0xb   :  { %2084 = vmatpush3.bf16.msra.mxu0 %v2689_v3  ;;  %v275_v36 = vpack.c.bf16 %v273_v35, %v272_v34  ;;  %v55_v37 = vld [vmem:[%s3348_s10 + $0x20] sm:$0xff]  ;;  %v56_v38 = vld [vmem:[%s3348_s10 + $0x28] sm:$0xff]  ;;  %v58_v41 = vld [vmem:[%s3348_s10 + $0x38] sm:$0xff] }
   0xc   :  { %2085 = vmatprep.subr.bf16.mxu0 %v2690_v7  ;;  %v2942_v39 = vpack.c.bf16 %v56_v38, %v55_v37  ;;  %v2952_v42 = vpack.c.bf16 %v58_v41, %v57_v40  ;;  %v59_v43 = vld [vmem:[%s3348_s10 + $0x40] sm:$0xff]  ;;  %v60_v44 = vld [vmem:[%s3348_s10 + $0x48] sm:$0xff]  ;;  %v62_v47 = vld [vmem:[%s3348_s10 + $0x58] sm:$0xff] }
   0xd   :  { %2472 = vmatpush3.bf16.msra.mxu1 %v2895_v22  ;;  %v2962_v45 = vpack.c.bf16 %v60_v44, %v59_v43  ;;  %v2972_v48 = vpack.c.bf16 %v62_v47, %v61_v46  ;;  %v63_v49 = vld [vmem:[%s3348_s10 + $0x60] sm:$0xff]  ;;  %v64_v50 = vld [vmem:[%s3348_s10 + $0x68] sm:$0xff]  ;;  %v65_v53 = vld [vmem:[%s3348_s10 + $0x70] sm:$0xff] }
   0xe   :  { %2473 = vmatprep.subr.bf16.mxu1 %v2753_v1  ;;  %v2981_v51 = vpack.c.bf16 %v64_v50, %v63_v49  ;;  %v66_v54 = vld [vmem:[%s3348_s10 + $0x78] sm:$0xff]  ;;  %v1789_v57 = vld [vmem:[%s3349_s3] ss:$0 sm:$0xff]  ;;  %v2700_v38 = vld [vmem:[%s3350_s6 + $0x8] sm:$0xff]  }
   0xf   :  { %2086 = vmatpush3.bf16.msra.mxu0 %v2690_v7  ;;  %v2997_v55 = vpack.c.bf16 %v66_v54, %v65_v53  ;;  %v2699_v37 = vld [vmem:[%s3350_s6] sm:$0xff]   ;;  %v2701_v40 = vld [vmem:[%s3350_s6 + $0x10] sm:$0xff]   ;;  %v2702_v41 = vld [vmem:[%s3350_s6 + $0x18] sm:$0xff]  }
  0x10   :  { %2091 = vmatprep.subr.bf16.mxu0 %v2691_v8  ;;  %v2703_v43 = vld [vmem:[%s3350_s6 + $0x20] sm:$0xff]   ;;  %v2704_v44 = vld [vmem:[%s3350_s6 + $0x28] sm:$0xff]   ;;  %v2705_v46 = vld [vmem:[%s3350_s6 + $0x30] sm:$0xff]  }
  0x11   :  { %2475 = vmatpush3.bf16.msra.mxu1 %v2942_v39  ;;  %v2706_v47 = vld [vmem:[%s3350_s6 + $0x38] sm:$0xff]   ;;  %v2707_v49 = vld [vmem:[%s3350_s6 + $0x40] sm:$0xff]  }
  0x12   :  { %2088 = vmatmul.mubr.msk.bf16.vlgmr.msra.gmra.mrb[0].mxu0 %vm106_vm0, %v73_v13  ;;  %2476 = vmatprep.subr.bf16.mxu1 %v2753_v1  ;;  %v3026_v13 = vsub.s32 0, %v3023_v12 }
  0x13   :  { %2092 = vmatpush3.bf16.msra.mxu0 %v2691_v8  ;;  %2099 = vmatprep.mubr.msk.bf16.mxu0 %vm106_vm0, %v176_v14 }
  0x14   :  { %2093 = vmatprep.subr.bf16.mxu0 %v2692_v15 }
  0x15   :  { %2478 = vmatpush3.bf16.msra.mxu1 %v2952_v42 }
  0x16   :  { %2479 = vmatprep.subr.bf16.mxu1 %v2753_v1 }
  0x17   :  { %2094 = vmatpush3.bf16.msra.mxu0 %v2692_v15 }
  0x18   :  { %2095 = vmatprep.subr.bf16.mxu0 %v2693_v21 }
  0x19   :  { %2481 = vmatpush3.bf16.msra.mxu1 %v2962_v45 }
  0x1a   :  { %2482 = vmatprep.subr.bf16.mxu1 %v2753_v1 }
  0x1b   :  { %2096 = vmatpush3.bf16.msra.mxu0 %v2693_v21 }
  0x1c   :  { %2097 = vmatprep.subr.bf16.mxu0 %v2694_v23 }
  0x1d   :  { %2484 = vmatpush3.bf16.msra.mxu1 %v2972_v48 }
  0x1e   :  { %2485 = vmatprep.subr.bf16.mxu1 %v2753_v1 }
  0x1f   :  { %2098 = vmatpush3.bf16.msra.mxu0 %v2694_v23 }
  0x20   :  { %2103 = vmatprep.subr.bf16.mxu0 %v2695_v26 }
  0x21   :  { %2487 = vmatpush3.bf16.msra.mxu1 %v2981_v51 }
  0x22   :  { %2100 = vmatmul.mubr.msk.bf16.vlgmr.msra.gmra.mrb[0].mxu0 %vm106_vm0, %v177_v29  ;;  %2488 = vmatprep.subr.bf16.mxu1 %v2753_v1 }
  0x23   :  { %2104 = vmatpush3.bf16.msra.mxu0 %v2695_v26  ;;  %2111 = vmatprep.mubr.msk.bf16.mxu0 %vm106_vm0, %v274_v30 }
  0x24   :  { %2105 = vmatprep.subr.bf16.mxu0 %v2696_v31 }
  0x25   :  { %2490 = vmatpush3.bf16.msra.mxu1 %v2997_v55 }
  0x26   :  { %2491 = vmatprep.subr.bf16.mxu1 %v2753_v1 }
  0x27   :  { %2106 = vmatpush3.bf16.msra.mxu0 %v2696_v31 }
  0x28   :  { %2107 = vmatprep.subr.bf16.mxu0 %v2697_v32 }
  0x2b   :  { %2108 = vmatpush3.bf16.msra.mxu0 %v2697_v32 }
  0x2c   :  { %2109 = vmatprep.subr.bf16.mxu0 %v2698_v33 }
  0x2f   :  { %2110 = vmatpush3.bf16.msra.mxu0 %v2698_v33 }
  0x30   :  { %2185 = vmatprep.subr.bf16.mxu0 %v2699_v37 }
  0x32   :  { %2112 = vmatmul.mubr.msk.bf16.vlgmr.msra.gmra.mrb[0].mxu0 %vm106_vm0, %v275_v36 }
  0x33   :  { %2186 = vmatpush3.bf16.msra.mxu0 %v2699_v37  ;;  %v2716_v37 = vld [vmem:[%s3350_s6 + $0x88] sm:$0xff]  }
  0x34   :  { %2187 = vmatprep.subr.bf16.mxu0 %v2700_v38 }
  0x37   :  { %2188 = vmatpush3.bf16.msra.mxu0 %v2700_v38 }
  0x38   :  { %2189 = vmatprep.subr.bf16.mxu0 %v2701_v40 }
  0x3b   :  { %2190 = vmatpush3.bf16.msra.mxu0 %v2701_v40  ;;  %v2717_v40 = vld [vmem:[%s3350_s6 + $0x90] sm:$0xff]  }
  0x3c   :  { %2191 = vmatprep.subr.bf16.mxu0 %v2702_v41 }
  0x3f   :  { %2192 = vmatpush3.bf16.msra.mxu0 %v2702_v41  ;;  %v2718_v41 = vld [vmem:[%s3350_s6 + $0x98] sm:$0xff]  }
  0x40   :  { %2193 = vmatprep.subr.bf16.mxu0 %v2703_v43 }
  0x43   :  { %2194 = vmatpush3.bf16.msra.mxu0 %v2703_v43  ;;  %v2719_v43 = vld [vmem:[%s3350_s6 + $0xa0] sm:$0xff]  }
  0x44   :  { %2195 = vmatprep.subr.bf16.mxu0 %v2704_v44 }
  0x47   :  { %2196 = vmatpush3.bf16.msra.mxu0 %v2704_v44  ;;  %v2720_v44 = vld [vmem:[%s3350_s6 + $0xa8] sm:$0xff]  }
  0x48   :  { %2197 = vmatprep.subr.bf16.mxu0 %v2705_v46 }
  0x4b   :  { %2198 = vmatpush3.bf16.msra.mxu0 %v2705_v46  ;;  %v2721_v46 = vld [vmem:[%s3350_s6 + $0xb0] sm:$0xff]  }
  0x4c   :  { %2199 = vmatprep.subr.bf16.mxu0 %v2706_v47 }
  0x4f   :  { %2200 = vmatpush3.bf16.msra.mxu0 %v2706_v47  ;;  %v2722_v47 = vld [vmem:[%s3350_s6 + $0xb8] sm:$0xff]  }
  0x50   :  { %2205 = vmatprep.subr.bf16.mxu0 %v2707_v49 }
 0x105   :  { %v2113_v56 = vpop.f32.mrb[0].mxu0 }
 0x106   :  { %v349_v58 = vpop.f32.mrb[1].mxu0  ;;  %v2659_v63 = vadd.f32 %v2113_v56, %v1789_v57 }
 0x107   :  { %v2114_v59 = vpop.f32.mrb[2].mxu0  ;;  %v2660_v61 = vadd.f32 %v1789_v57, %v349_v58 }
 0x108   :  { %v352_v60 = vpop.f32.mrb[3].mxu0  ;;  %v2661_v2 = vadd.f32 %v2114_v59, %v1789_v57 }
 0x109   :  { %v2662_v62 = vadd.f32 %v1789_v57, %v352_v60  ;;  %v368_v57 = vld [vmem:[%s3351_s4] sm:$0x1] }
 0x10b   :  { %v370_v0 = vadd.f32 %v2662_v62, %v2660_v61 }
 0x10d   :  { %v371_v3 = vadd.f32 %v2659_v63, %v370_v0 }
 0x10f   :  { %v372_v4 = vadd.f32 %v2661_v2, %v371_v3 }
 0x111   :  { %v373_v5 = vrot.slane %v372_v4, 4 }
 0x113   :  { %v374_v6 = vadd.f32 %v373_v5, %v372_v4 }
 0x115   :  { %v375_v7 = vrot.slane %v374_v6, 2 }
 0x117   :  { %v376_v8 = vadd.f32 %v375_v7, %v374_v6 }
 0x119   :  { %v377_v9 = vrot.slane %v376_v8, 1 }
 0x11b   :  { %v378_v10 = vadd.f32 %v377_v9, %v376_v8 }
 0x11d   :  { %2148 = vmatmul.mubr.f32.vlgmr.msra.gmra.mrb[0].mxu1 %v378_v10 }
 0x11e   :  { %2493 = vmatpush3.bf16.msra.mxu1 %v2881_v18  ;;  %2182 = vmatprep.mubr.msk.f32.mxu1 %vm2754_vm1, %v2755_v52 }
 0x11f   :  { %2494 = vmatprep.subr.bf16.mxu1 %v2753_v1 }
 0x122   :  { %2496 = vmatpush3.bf16.msra.mxu1 %v2895_v22 }
 0x123   :  { %2497 = vmatprep.subr.bf16.mxu1 %v2753_v1 }
 0x126   :  { %2499 = vmatpush3.bf16.msra.mxu1 %v2942_v39 }
 0x127   :  { %2500 = vmatprep.subr.bf16.mxu1 %v2753_v1 }
 0x12a   :  { %2502 = vmatpush3.bf16.msra.mxu1 %v2952_v42 }
 0x12b   :  { %2503 = vmatprep.subr.bf16.mxu1 %v2753_v1 }
 0x12e   :  { %2505 = vmatpush3.bf16.msra.mxu1 %v2962_v45 }
 0x12f   :  { %2506 = vmatprep.subr.bf16.mxu1 %v2753_v1 }
 0x132   :  { %2508 = vmatpush3.bf16.msra.mxu1 %v2972_v48 }
 0x133   :  { %2509 = vmatprep.subr.bf16.mxu1 %v2753_v1 }
 0x136   :  { %2511 = vmatpush3.bf16.msra.mxu1 %v2981_v51 }
 0x137   :  { %2512 = vmatprep.subr.bf16.mxu1 %v2753_v1 }
 0x13a   :  { %2514 = vmatpush3.bf16.msra.mxu1 %v2997_v55 }
 0x13b   :  { %2515 = vmatprep.subr.bf16.mxu1 %v2753_v1 }
 0x1f0   :  { %v445_v14 = vpop.f32.mrb[0].mxu1 }
 0x1f1   :  { %v449_v15 = vmul.f32 0.001953125, %v445_v14  ;;  %v2149_v16 = vpop.f32.mrb[1].mxu1 }
 0x1f3   :  { %v453_v17 = vrot.slane %v449_v15, %v3026_v13 }
 0x1f5   :  { %v3029_v19 = vsub.f32 %v2660_v61, %v453_v17  ;;  %v3031_v20 = vsub.f32 %v2662_v62, %v453_v17  ;;  %v3033_v21 = vsub.f32 %v2659_v63, %v453_v17  ;;  %v3035_v23 = vsub.f32 %v2661_v2, %v453_v17  ;;  %v1818_v61 = vld [vmem:[%s3352_s5] ss:$0 sm:$0xff] }
 0x1f7   :  { %v458_v24 = vmul.f32 %v3029_v19, %v3029_v19  ;;  %v459_v25 = vmul.f32 %v3031_v20, %v3031_v20  ;;  %v460_v26 = vmul.f32 %v3033_v21, %v3033_v21  ;;  %v461_v28 = vmul.f32 %v3035_v23, %v3035_v23 }
 0x1f9   :  { %v462_v27 = vadd.f32 %v459_v25, %v458_v24  ;;  %v2708_v25 = vld [vmem:[%s3350_s6 + $0x48] sm:$0xff]  }
 0x1fb   :  { %v463_v29 = vadd.f32 %v462_v27, %v460_v26  ;;  %v2709_v27 = vld [vmem:[%s3350_s6 + $0x50] sm:$0xff]  }
 0x1fd   :  { %v464_v30 = vadd.f32 %v463_v29, %v461_v28  ;;  %v2710_v28 = vld [vmem:[%s3350_s6 + $0x58] sm:$0xff]   ;;  %v2711_v29 = vld [vmem:[%s3350_s6 + $0x60] sm:$0xff]  }
 0x1ff   :  { %v465_v31 = vrot.slane %v464_v30, 4 }
 0x201   :  { %v466_v32 = vadd.f32 %v465_v31, %v464_v30  ;;  %v2712_v30 = vld [vmem:[%s3350_s6 + $0x68] sm:$0xff]   ;;  %v2713_v31 = vld [vmem:[%s3350_s6 + $0x70] sm:$0xff]  }
 0x203   :  { %v467_v33 = vrot.slane %v466_v32, 2 }
 0x205   :  { %v468_v34 = vadd.f32 %v467_v33, %v466_v32  ;;  %v2714_v32 = vld [vmem:[%s3350_s6 + $0x78] sm:$0xff]   ;;  %v2715_v33 = vld [vmem:[%s3350_s6 + $0x80] sm:$0xff]  }
 0x207   :  { %v469_v35 = vrot.slane %v468_v34, 1 }
 0x209   :  { %v470_v36 = vadd.f32 %v469_v35, %v468_v34 }
 0x20b   :  { %2183 = vmatmul.mubr.f32.vlgmr.msra.gmra.mrb[2].mxu1 %v470_v36 }
 0x20c   :  { %2517 = vmatpush3.bf16.msra.mxu1 %v2881_v18  ;;  %2277 = vmatprep.mubr.msk.f32.mxu1 %vm2754_vm1, %v2755_v52 }
 0x20d   :  { %2518 = vmatprep.subr.bf16.mxu1 %v2753_v1 }
 0x210   :  { %2520 = vmatpush3.bf16.msra.mxu1 %v2895_v22 }
 0x211   :  { %2521 = vmatprep.subr.bf16.mxu1 %v2753_v1 }
 0x214   :  { %2523 = vmatpush3.bf16.msra.mxu1 %v2942_v39 }
 0x215   :  { %2524 = vmatprep.subr.bf16.mxu1 %v2753_v1 }
 0x218   :  { %2526 = vmatpush3.bf16.msra.mxu1 %v2952_v42 }
 0x219   :  { %2527 = vmatprep.subr.bf16.mxu1 %v2753_v1 }
 0x21c   :  { %2529 = vmatpush3.bf16.msra.mxu1 %v2962_v45 }
 0x21d   :  { %2530 = vmatprep.subr.bf16.mxu1 %v2753_v1 }
 0x220   :  { %2532 = vmatpush3.bf16.msra.mxu1 %v2972_v48 }
 0x221   :  { %2533 = vmatprep.subr.bf16.mxu1 %v2753_v1 }
 0x224   :  { %2535 = vmatpush3.bf16.msra.mxu1 %v2981_v51 }
 0x225   :  { %2536 = vmatprep.subr.bf16.mxu1 %v2753_v1 }
 0x228   :  { %2538 = vmatpush3.bf16.msra.mxu1 %v2997_v55 }
 0x229   :  { %2539 = vmatprep.subr.bf16.mxu1 %v2753_v1 }
 0x2de   :  { %v537_v50 = vpop.f32.mrb[2].mxu1 }
 0x2df   :  { %v541_v53 = vmul.f32 0.001953125, %v537_v50  ;;  %v2184_v54 = vpop.f32.mrb[3].mxu1 }
 0x2e0   :  { %v1827_v54 = vld [vmem:[%s3353_s7] ss:$0 sm:$0xff] }
 0x2e1   :  { %v542_v56 = vadd.f32 1e-05, %v541_v53 }
 0x2e3   :  { %2727 = vrsqrt.f32 %v542_v56 }
 0x2ed   :  { %v2728_v58 = vpop.eup %2727 }
 0x2ee   :  { %v544_v59 = vmul.f32 %v2728_v58, %v368_v57 }
 0x2f0   :  { %v549_v60 = vrot.slane %v544_v59, %v3026_v13 }
 0x2f2   :  { %v551_v62 = vmul.f32 %v549_v60, %v3029_v19  ;;  %v552_v63 = vmul.f32 %v549_v60, %v3031_v20  ;;  %v553_v0 = vmul.f32 %v549_v60, %v3033_v21  ;;  %v554_v2 = vmul.f32 %v549_v60, %v3035_v23 }
 0x2f4   :  { %v561_v3 = vadd.f32 %v1818_v61, %v551_v62  ;;  %v562_v4 = vadd.f32 %v1818_v61, %v552_v63  ;;  %v563_v5 = vadd.f32 %v1818_v61, %v553_v0  ;;  %v564_v6 = vadd.f32 %v1818_v61, %v554_v2 }
 0x2f6   :  { %vm565_vm2 = vcmp.ge.f32.partialorder %v561_v3, 0.0  ;;  %vm566_vm3 = vcmp.ge.f32.partialorder %v562_v4, 0.0  ;;  %vm567_vm4 = vcmp.ge.f32.partialorder %v563_v5, 0.0  ;;  %vm568_vm5 = vcmp.ge.f32.partialorder %v564_v6, 0.0 }
 0x2f7   :  { %v569_v7 = vmul.f32 0.1, %v561_v3  ;;  %v570_v8 = vmul.f32 0.1, %v562_v4  ;;  %v571_v9 = vmul.f32 0.1, %v563_v5 }
 0x2f8   :  { %v572_v10 = vmul.f32 0.1, %v564_v6 }
 0x2f9   :  { %v573_v11 = vsel %vm565_vm2, %v561_v3, %v569_v7  ;;  %v574_v14 = vsel %vm566_vm3, %v562_v4, %v570_v8  ;;  %v575_v15 = vsel %vm567_vm4, %v563_v5, %v571_v9 }
 0x2fa   :  { %v576_v16 = vsel %vm568_vm5, %v564_v6, %v572_v10  ;;  %581 = vst [vmem:[#allocation2 + $0x1] sm:$0xff] %v573_v11  ;;  %582 = vst [vmem:[#allocation2 + $0x9] sm:$0xff] %v574_v14  ;;  %v719_v26 = vpack.c.bf16 %v574_v14, %v573_v11 }
 0x2fb   :  { %583 = vst [vmem:[#allocation2 + $0x19] sm:$0xff] %v575_v15  ;;  %584 = vst [vmem:[#allocation2 + $0x21] sm:$0xff] %v576_v16  ;;  %v720_v36 = vpack.c.bf16 %v576_v16, %v575_v15 }
 0x301   :  { %v586_v17 = vld [vmem:[#allocation2] sm:$0xff]  ;;  %v587_v19 = vld [vmem:[#allocation2 + $0x8] sm:$0xff] }
 0x302   :  { %v588_v20 = vld [vmem:[#allocation2 + $0x18] sm:$0xff]  ;;  %v590_v21 = vpack.c.bf16 %v587_v19, %v586_v17  ;;  %v589_v23 = vld [vmem:[#allocation2 + $0x20] sm:$0xff]  ;;  %v840_v35 = vld [vmem:[#allocation2 + $0xa] sm:$0xff]  ;;  %v2756_v19 = vmov 1966171168  }
 0x303   :  { %v591_v24 = vpack.c.bf16 %v589_v23, %v588_v20  ;;  %v839_v34 = vld [vmem:[#allocation2 + $0x2] sm:$0xff]  ;;  %v1056_v20 = vunpack.c.l.s4 %v2756_v19 }
 0x304   :  { %2201 = vmatprep.mubr.bf16.mxu0 %v590_v21  ;;  %v843_v38 = vpack.c.bf16 %v840_v35, %v839_v34  ;;  %v842_v50 = vld [vmem:[#allocation2 + $0x22] sm:$0xff] }
 0x305   :  { %2202 = vmatmul.mubr.bf16.vlgmr.msra.gmra.mrb[4].mxu0 %v591_v24  ;;  %v1057_v21 = vunpack.c.0.s8 %v1056_v20 }
 0x306   :  { %2206 = vmatpush3.bf16.msra.mxu0 %v2707_v49  ;;  %2221 = vmatprep.mubr.bf16.mxu0 %v719_v26  ;;  %v841_v49 = vld [vmem:[#allocation2 + $0x1a] sm:$0xff] }
 0x307   :  { %2207 = vmatprep.subr.bf16.mxu0 %v2708_v25  ;;  %v844_v53 = vpack.c.bf16 %v842_v50, %v841_v49  ;;  %v1060_v23 = vsub.s32 %v1057_v21, %v3023_v12 }
 0x30a   :  { %2208 = vmatpush3.bf16.msra.mxu0 %v2708_v25 }
 0x30b   :  { %2209 = vmatprep.subr.bf16.mxu0 %v2709_v27 }
 0x30e   :  { %2210 = vmatpush3.bf16.msra.mxu0 %v2709_v27 }
 0x30f   :  { %2211 = vmatprep.subr.bf16.mxu0 %v2710_v28 }
 0x312   :  { %2212 = vmatpush3.bf16.msra.mxu0 %v2710_v28 }
 0x313   :  { %2213 = vmatprep.subr.bf16.mxu0 %v2711_v29 }
 0x316   :  { %2214 = vmatpush3.bf16.msra.mxu0 %v2711_v29 }
 0x317   :  { %2215 = vmatprep.subr.bf16.mxu0 %v2712_v30 }
 0x31a   :  { %2216 = vmatpush3.bf16.msra.mxu0 %v2712_v30 }
 0x31b   :  { %2217 = vmatprep.subr.bf16.mxu0 %v2713_v31 }
 0x31e   :  { %2218 = vmatpush3.bf16.msra.mxu0 %v2713_v31 }
 0x31f   :  { %2219 = vmatprep.subr.bf16.mxu0 %v2714_v32 }
 0x322   :  { %2220 = vmatpush3.bf16.msra.mxu0 %v2714_v32 }
 0x323   :  { %2225 = vmatprep.subr.bf16.mxu0 %v2715_v33 }
 0x325   :  { %2222 = vmatmul.mubr.bf16.vlgmr.msra.gmra.mrb[4].mxu0 %v720_v36 }
 0x326   :  { %2226 = vmatpush3.bf16.msra.mxu0 %v2715_v33  ;;  %2241 = vmatprep.mubr.bf16.mxu0 %v843_v38 }
 0x327   :  { %2227 = vmatprep.subr.bf16.mxu0 %v2716_v37 }
 0x32a   :  { %2228 = vmatpush3.bf16.msra.mxu0 %v2716_v37 }
 0x32b   :  { %2229 = vmatprep.subr.bf16.mxu0 %v2717_v40 }
 0x32e   :  { %2230 = vmatpush3.bf16.msra.mxu0 %v2717_v40 }
 0x32f   :  { %2231 = vmatprep.subr.bf16.mxu0 %v2718_v41 }
 0x332   :  { %2232 = vmatpush3.bf16.msra.mxu0 %v2718_v41 }
 0x333   :  { %2233 = vmatprep.subr.bf16.mxu0 %v2719_v43 }
 0x336   :  { %2234 = vmatpush3.bf16.msra.mxu0 %v2719_v43 }
 0x337   :  { %2235 = vmatprep.subr.bf16.mxu0 %v2720_v44 }
 0x33a   :  { %2236 = vmatpush3.bf16.msra.mxu0 %v2720_v44 }
 0x33b   :  { %2237 = vmatprep.subr.bf16.mxu0 %v2721_v46 }
 0x33e   :  { %2238 = vmatpush3.bf16.msra.mxu0 %v2721_v46 }
 0x33f   :  { %2239 = vmatprep.subr.bf16.mxu0 %v2722_v47 }
 0x342   :  { %2240 = vmatpush3.bf16.msra.mxu0 %v2722_v47 }
 0x343   :  { %2587 = vmatprep.subr.bf16.mxu0 %v2753_v1 }
 0x345   :  { %2242 = vmatmul.mubr.bf16.vlgmr.msra.gmra.mrb[4].mxu0 %v844_v53 }
 0x346   :  { %2589 = vmatpush3.bf16.msra.mxu0 %v2881_v18  ;;  %2382 = vmatprep.mubr.msk.f32.mxu0 %vm2754_vm1, %v2755_v52 }
 0x347   :  { %2590 = vmatprep.subr.bf16.mxu0 %v2753_v1 }
 0x34a   :  { %2592 = vmatpush3.bf16.msra.mxu0 %v2895_v22 }
 0x34b   :  { %2593 = vmatprep.subr.bf16.mxu0 %v2753_v1 }
 0x34e   :  { %2595 = vmatpush3.bf16.msra.mxu0 %v2942_v39 }
 0x34f   :  { %2596 = vmatprep.subr.bf16.mxu0 %v2753_v1 }
 0x352   :  { %2598 = vmatpush3.bf16.msra.mxu0 %v2952_v42 }
 0x353   :  { %2599 = vmatprep.subr.bf16.mxu0 %v2753_v1 }
 0x356   :  { %2601 = vmatpush3.bf16.msra.mxu0 %v2962_v45 }
 0x357   :  { %2602 = vmatprep.subr.bf16.mxu0 %v2753_v1 }
 0x35a   :  { %2604 = vmatpush3.bf16.msra.mxu0 %v2972_v48 }
 0x35b   :  { %2605 = vmatprep.subr.bf16.mxu0 %v2753_v1 }
 0x35e   :  { %2607 = vmatpush3.bf16.msra.mxu0 %v2981_v51 }
 0x35f   :  { %2608 = vmatprep.subr.bf16.mxu0 %v2753_v1 }
 0x362   :  { %2610 = vmatpush3.bf16.msra.mxu0 %v2997_v55 }
 0x363   :  { %2611 = vmatprep.subr.bf16.mxu0 %v2753_v1 }
 0x418   :  { %v2243_v56 = vpop.f32.mrb[4].mxu0 }
 0x419   :  { %v944_v57 = vpop.f32.mrb[5].mxu0  ;;  %v3168_v59 = vadd.f32 %v2243_v56, %v1827_v54 }
 0x41a   :  { %v2244_v58 = vpop.f32.mrb[6].mxu0  ;;  %v3172_v62 = vadd.f32 %v1827_v54, %v944_v57 }
 0x41b   :  { %v3170_v60 = vadd.f32 %v2244_v58, %v1827_v54  ;;  %v947_v61 = vpop.f32.mrb[7].mxu0 }
 0x41c   :  { %v3174_v63 = vadd.f32 %v1827_v54, %v947_v61 }
 0x41d   :  { %v970_v0 = vadd.f32 %v3170_v60, %v3168_v59 }
 0x41e   :  { %v963_v2 = vadd.f32 %v3174_v63, %v3172_v62 }
 0x41f   :  { %v971_v3 = vrot.slane %v970_v0, 4 }
 0x420   :  { %v964_v4 = vrot.slane %v963_v2, 4 }
 0x421   :  { %v972_v5 = vadd.f32 %v971_v3, %v970_v0  ;;  %v3227_v3 = vld [vmem:[%s3354_s11] sm:$0xff]  }
 0x422   :  { %v965_v6 = vadd.f32 %v964_v4, %v963_v2 }
 0x423   :  { %v973_v7 = vrot.slane %v972_v5, 2 }
 0x424   :  { %v966_v8 = vrot.slane %v965_v6, 2 }
 0x425   :  { %v974_v9 = vadd.f32 %v973_v7, %v972_v5 }
 0x426   :  { %v967_v10 = vadd.f32 %v966_v8, %v965_v6 }
 0x427   :  { %v975_v11 = vrot.slane %v974_v9, 1 }
 0x428   :  { %v968_v14 = vrot.slane %v967_v10, 1 }
 0x429   :  { %v976_v15 = vadd.f32 %v975_v11, %v974_v9 }
 0x42a   :  { %v969_v16 = vadd.f32 %v968_v14, %v967_v10 }
 0x42c   :  { %v980_v17 = vsel %vm979_vm6, %v976_v15, %v969_v16 }
 0x42d   :  { %2278 = vmatmul.mubr.f32.vlgmr.msra.gmra.mrb[4].mxu1 %v980_v17 }
 0x42e   :  { %2541 = vmatpush3.bf16.msra.mxu1 %v2881_v18  ;;  %2312 = vmatprep.mubr.msk.f32.mxu1 %vm2754_vm1, %v2755_v52 }
 0x42f   :  { %2542 = vmatprep.subr.bf16.mxu1 %v2753_v1 }
 0x432   :  { %2544 = vmatpush3.bf16.msra.mxu1 %v2895_v22 }
 0x433   :  { %2545 = vmatprep.subr.bf16.mxu1 %v2753_v1 }
 0x436   :  { %2547 = vmatpush3.bf16.msra.mxu1 %v2942_v39 }
 0x437   :  { %2548 = vmatprep.subr.bf16.mxu1 %v2753_v1 }
 0x43a   :  { %2550 = vmatpush3.bf16.msra.mxu1 %v2952_v42 }
 0x43b   :  { %2551 = vmatprep.subr.bf16.mxu1 %v2753_v1 }
 0x43e   :  { %2553 = vmatpush3.bf16.msra.mxu1 %v2962_v45 }
 0x43f   :  { %2554 = vmatprep.subr.bf16.mxu1 %v2753_v1 }
 0x442   :  { %2556 = vmatpush3.bf16.msra.mxu1 %v2972_v48 }
 0x443   :  { %2557 = vmatprep.subr.bf16.mxu1 %v2753_v1 }
 0x446   :  { %2559 = vmatpush3.bf16.msra.mxu1 %v2981_v51 }
 0x447   :  { %2560 = vmatprep.subr.bf16.mxu1 %v2753_v1 }
 0x44a   :  { %2562 = vmatpush3.bf16.msra.mxu1 %v2997_v55 }
 0x44b   :  { %2563 = vmatprep.subr.bf16.mxu1 %v2753_v1 }
 0x500   :  { %v1048_v24 = vpop.f32.mrb[4].mxu1 }
 0x501   :  { %v1053_v25 = vmul.f32 0.00390625, %v1048_v24  ;;  %v2279_v26 = vpop.f32.mrb[5].mxu1 }
 0x503   :  { %v1061_v27 = vrot.slane %v1053_v25, %v1060_v23 }
 0x505   :  { %v1062_v28 = vcombine.high %v1061_v27, %v1061_v27  ;;  %v1069_v29 = vrot.slane %v1061_v27, %v1060_v23 }
 0x507   :  { %v1076_v30 = vrot.slane %v1062_v28, %v1060_v23  ;;  %v1080_v31 = vrot.slane %v1069_v29, %v3026_v13 }
 0x509   :  { %v1084_v32 = vrot.slane %v1076_v30, %v3026_v13  ;;  %v1087_v33 = vsub.f32 %v3172_v62, %v1080_v31  ;;  %v1088_v34 = vsub.f32 %v3174_v63, %v1080_v31 }
 0x50b   :  { %v1089_v35 = vsub.f32 %v3168_v59, %v1084_v32  ;;  %v1090_v36 = vsub.f32 %v3170_v60, %v1084_v32  ;;  %v1091_v12 = vmul.f32 %v1087_v33, %v1087_v33  ;;  %v1092_v37 = vmul.f32 %v1088_v34, %v1088_v34 }
 0x50d   :  { %v1093_v38 = vmul.f32 %v1089_v35, %v1089_v35  ;;  %v1094_v40 = vmul.f32 %v1090_v36, %v1090_v36  ;;  %v1095_v41 = vadd.f32 %v1092_v37, %v1091_v12 }
 0x50f   :  { %v1096_v43 = vrot.slane %v1095_v41, 4  ;;  %v1102_v44 = vadd.f32 %v1094_v40, %v1093_v38 }
 0x511   :  { %v1097_v46 = vadd.f32 %v1096_v43, %v1095_v41  ;;  %v1103_v47 = vrot.slane %v1102_v44, 4 }
 0x513   :  { %v1098_v49 = vrot.slane %v1097_v46, 2  ;;  %v1104_v50 = vadd.f32 %v1103_v47, %v1102_v44 }
 0x515   :  { %v1099_v53 = vadd.f32 %v1098_v49, %v1097_v46  ;;  %v1105_v54 = vrot.slane %v1104_v50, 2 }
 0x517   :  { %v1100_v56 = vrot.slane %v1099_v53, 1  ;;  %v1106_v57 = vadd.f32 %v1105_v54, %v1104_v50 }
 0x519   :  { %v1107_v58 = vrot.slane %v1106_v57, 1  ;;  %v1101_v61 = vadd.f32 %v1100_v56, %v1099_v53 }
 0x51b   :  { %v1108_v0 = vadd.f32 %v1107_v58, %v1106_v57 }
 0x51d   :  { %v1111_v2 = vsel %vm979_vm6, %v1108_v0, %v1101_v61 }
 0x51e   :  { %2313 = vmatmul.mubr.f32.vlgmr.msra.gmra.mrb[6].mxu1 %v1111_v2 }
 0x51f   :  { %2565 = vmatpush3.bf16.msra.mxu1 %v2881_v18  ;;  %2347 = vmatprep.mubr.msk.f32.mxu1 %vm2754_vm1, %v2755_v52 }
 0x520   :  { %2566 = vmatprep.subr.bf16.mxu1 %v2753_v1 }
 0x523   :  { %2568 = vmatpush3.bf16.msra.mxu1 %v2895_v22 }
 0x524   :  { %2569 = vmatprep.subr.bf16.mxu1 %v2753_v1 }
 0x527   :  { %2571 = vmatpush3.bf16.msra.mxu1 %v2942_v39 }
 0x528   :  { %2572 = vmatprep.subr.bf16.mxu1 %v2753_v1 }
 0x52b   :  { %2574 = vmatpush3.bf16.msra.mxu1 %v2952_v42 }
 0x52c   :  { %2575 = vmatprep.subr.bf16.mxu1 %v2753_v1 }
 0x52f   :  { %2577 = vmatpush3.bf16.msra.mxu1 %v2962_v45 }
 0x530   :  { %2578 = vmatprep.subr.bf16.mxu1 %v2753_v1 }
 0x533   :  { %2580 = vmatpush3.bf16.msra.mxu1 %v2972_v48 }
 0x534   :  { %2581 = vmatprep.subr.bf16.mxu1 %v2753_v1 }
 0x537   :  { %2583 = vmatpush3.bf16.msra.mxu1 %v2981_v51 }
 0x538   :  { %2584 = vmatprep.subr.bf16.mxu1 %v2753_v1 }
 0x53b   :  { %2586 = vmatpush3.bf16.msra.mxu1 %v2997_v55 }
 0x53c   :  { %2385 = vmatprep.subr.bf16.mxu1 %v3227_v3 }
 0x5f1   :  { %v1179_v4 = vpop.f32.mrb[6].mxu1 }
 0x5f2   :  { %v1190_v5 = vrot.slane %v1179_v4, %v1060_v23  ;;  %v2314_v6 = vpop.f32.mrb[7].mxu1 }
 0x5f4   :  { %v1191_v7 = vcombine.high %v1190_v5, %v1190_v5  ;;  %v1198_v8 = vrot.slane %v1190_v5, %v1060_v23 }
 0x5f6   :  { %v1205_v9 = vrot.slane %v1191_v7, %v1060_v23  ;;  %v1209_v10 = vmul.f32 0.003921569, %v1198_v8  ;;  %v1462_v7 = vld [vmem:[%s3355_s1] sm:$0xff] }
 0x5f8   :  { %v1210_v11 = vmul.f32 0.003921569, %v1205_v9  ;;  %v1211_v14 = vadd.f32 0.0001, %v1209_v10  ;;  %v2725_v9 = vld [vmem:[%s3354_s11 + $0x10] sm:$0xff]   ;;  %v2726_v10 = vld [vmem:[%s3354_s11 + $0x18] sm:$0xff]  }
 0x5fa   :  { %v1212_v15 = vadd.f32 0.0001, %v1210_v11  ;;  %v1213_v16 = vmul.f32 4.0, %v1211_v14  ;;  %v1464_v11 = vld [vmem:[%s3355_s1 + $0x10] sm:$0xff] }
 0x5fc   :  { %v1214_v17 = vmul.f32 4.0, %v1212_v15  ;;  %v1220_v19 = vrot.slane %v1213_v16, %v3026_v13 }
 0x5fe   :  { %v1224_v20 = vrot.slane %v1214_v17, %v3026_v13  ;;  %2729 = vrcp.f32 %v1220_v19 }
 0x600   :  { %2731 = vrcp.f32 %v1224_v20 }
 0x608   :  { %v2730_v21 = vpop.eup %2729 }
 0x609   :  { %v1228_v24 = vmul.f32 %v2730_v21, %v1091_v12  ;;  %v1229_v25 = vmul.f32 %v2730_v21, %v1092_v37 }
 0x60a   :  { %v2732_v26 = vpop.eup %2731 }
 0x60b   :  { %v1231_v27 = vmul.f32 %v2732_v26, %v1093_v38  ;;  %v1232_v28 = vmul.f32 %v2732_v26, %v1094_v40  ;;  %v1233_v29 = vadd.f32 0.5, %v1228_v24  ;;  %v1234_v23 = vadd.f32 0.5, %v1229_v25 }
 0x60d   :  { %v1235_v30 = vadd.f32 0.5, %v1231_v27  ;;  %v1236_v31 = vadd.f32 0.5, %v1232_v28  ;;  %v1876_v32 = vmul.f32 -1.442695, %v1233_v29  ;;  %v1877_v33 = vmul.f32 -1.442695, %v1234_v23 }
 0x60f   :  { %2733 = vpow2.f32 %v1876_v32  ;;  %v1878_v34 = vmul.f32 -1.442695, %v1235_v30  ;;  %v1879_v35 = vmul.f32 -1.442695, %v1236_v31 }
 0x610   :  { %2735 = vpow2.f32 %v1877_v33 }
 0x611   :  { %2737 = vpow2.f32 %v1878_v34 }
 0x612   :  { %2739 = vpow2.f32 %v1879_v35 }
 0x619   :  { %v2734_v36 = vpop.eup %2733 }
 0x61a   :  { %v2736_v41 = vpop.eup %2735  ;;  %v1249_v43 = vadd.f32 1.0, %v2734_v36  ;;  %v1881_v36 = vld [vmem:[%s3356_s12] ss:$0 sm:$0xff] }
 0x61b   :  { %v2738_v12 = vpop.eup %2737  ;;  %v1250_v37 = vadd.f32 1.0, %v2736_v41 }
 0x61c   :  { %v2740_v44 = vpop.eup %2739  ;;  %v1251_v38 = vadd.f32 1.0, %v2738_v12  ;;  %2741 = vrcp.f32 %v1249_v43 }
 0x61d   :  { %v1252_v40 = vadd.f32 1.0, %v2740_v44  ;;  %2743 = vrcp.f32 %v1250_v37 }
 0x61e   :  { %2745 = vrcp.f32 %v1251_v38 }
 0x61f   :  { %2747 = vrcp.f32 %v1252_v40 }
 0x626   :  { %v2742_v46 = vpop.eup %2741 }
 0x627   :  { %v2744_v47 = vpop.eup %2743  ;;  %v1261_v49 = vmul.f32 %v2742_v46, %v3172_v62  ;;  %v1463_v62 = vld [vmem:[%s3355_s1 + $0x8] sm:$0xff] }
 0x628   :  { %v2746_v50 = vpop.eup %2745  ;;  %v1262_v53 = vmul.f32 %v2744_v47, %v3174_v63  ;;  %v1466_v8 = vpack.c.bf16 %v1463_v62, %v1462_v7 }
 0x629   :  { %v2748_v54 = vpop.eup %2747  ;;  %v1263_v56 = vmul.f32 %v2746_v50, %v3168_v59 }
 0x62a   :  { %v1267_v57 = vadd.f32 %v1262_v53, %v1261_v49  ;;  %v1264_v58 = vmul.f32 %v2748_v54, %v3170_v60  ;;  %v2724_v60 = vld [vmem:[%s3354_s11 + $0x8] sm:$0xff]  }
 0x62c   :  { %v1268_v61 = vadd.f32 %v1267_v57, %v1263_v56 }
 0x62e   :  { %v1269_v0 = vadd.f32 %v1268_v61, %v1264_v58 }
 0x630   :  { %v1270_v2 = vrot.slane %v1269_v0, 4 }
 0x632   :  { %v1271_v4 = vadd.f32 %v1270_v2, %v1269_v0 }
 0x634   :  { %v1272_v5 = vrot.slane %v1271_v4, 2 }
 0x636   :  { %v1273_v6 = vadd.f32 %v1272_v5, %v1271_v4 }
 0x638   :  { %v1274_v63 = vrot.slane %v1273_v6, 1 }
 0x63a   :  { %v1275_v59 = vadd.f32 %v1274_v63, %v1273_v6 }
 0x63c   :  { %2348 = vmatmul.mubr.f32.vlgmr.msra.gmra.mrb[8].mxu1 %v1275_v59 }
 0x63d   :  { %2386 = vmatpush3.bf16.msra.mxu1 %v3227_v3  ;;  %2393 = vmatprep.mubr.msk.bf16.mxu1 %vm106_vm0, %v1466_v8  ;;  %v1465_v3 = vld [vmem:[%s3355_s1 + $0x18] sm:$0xff] }
 0x63e   :  { %2387 = vmatprep.subr.bf16.mxu1 %v2724_v60  ;;  %v1467_v14 = vpack.c.bf16 %v1465_v3, %v1464_v11 }
 0x641   :  { %2388 = vmatpush3.bf16.msra.mxu1 %v2724_v60 }
 0x642   :  { %2389 = vmatprep.subr.bf16.mxu1 %v2725_v9 }
 0x645   :  { %2390 = vmatpush3.bf16.msra.mxu1 %v2725_v9 }
 0x646   :  { %2391 = vmatprep.subr.bf16.mxu1 %v2726_v10 }
 0x649   :  { %2392 = vmatpush3.bf16.msra.mxu1 %v2726_v10 }
 0x64a   :  { %2635 = vmatprep.subr.bf16.mxu1 %v2753_v1 }
 0x64c   :  { %2394 = vmatmul.mubr.msk.bf16.vlgmr.msra.gmra.mrb[12].mxu1 %vm106_vm0, %v1467_v14 }
 0x64d   :  { %2637 = vmatpush3.bf16.msra.mxu1 %v2881_v18  ;;  %2464 = vmatprep.mubr.msk.f32.mxu1 %vm2754_vm1, %v2755_v52 }
 0x64e   :  { %2638 = vmatprep.subr.bf16.mxu1 %v2753_v1 }
 0x651   :  { %2640 = vmatpush3.bf16.msra.mxu1 %v2895_v22 }
 0x652   :  { %2641 = vmatprep.subr.bf16.mxu1 %v2753_v1 }
 0x655   :  { %2643 = vmatpush3.bf16.msra.mxu1 %v2942_v39 }
 0x656   :  { %2644 = vmatprep.subr.bf16.mxu1 %v2753_v1 }
 0x659   :  { %2646 = vmatpush3.bf16.msra.mxu1 %v2952_v42 }
 0x65a   :  { %2647 = vmatprep.subr.bf16.mxu1 %v2753_v1 }
 0x65d   :  { %2649 = vmatpush3.bf16.msra.mxu1 %v2962_v45 }
 0x65e   :  { %2650 = vmatprep.subr.bf16.mxu1 %v2753_v1 }
 0x661   :  { %2652 = vmatpush3.bf16.msra.mxu1 %v2972_v48 }
 0x662   :  { %2653 = vmatprep.subr.bf16.mxu1 %v2753_v1 }
 0x665   :  { %2655 = vmatpush3.bf16.msra.mxu1 %v2981_v51 }
 0x666   :  { %2656 = vmatprep.subr.bf16.mxu1 %v2753_v1 }
 0x669   :  { %2658 = vmatpush3.bf16.msra.mxu1 %v2997_v55 }
 0x70f   :  { %v1342_v15 = vpop.f32.mrb[8].mxu1 }
 0x710   :  { %v1346_v16 = vmul.f32 0.001953125, %v1342_v15  ;;  %v2349_v17 = vpop.f32.mrb[9].mxu1 }
 0x712   :  { %v1350_v19 = vrot.slane %v1346_v16, %v3026_v13 }
 0x714   :  { %v3279_v20 = vsub.f32 %v1261_v49, %v1350_v19  ;;  %v3281_v21 = vsub.f32 %v1262_v53, %v1350_v19  ;;  %v3283_v24 = vsub.f32 %v1263_v56, %v1350_v19  ;;  %v3285_v25 = vsub.f32 %v1264_v58, %v1350_v19 }
 0x716   :  { %v1355_v26 = vmul.f32 %v3279_v20, %v3279_v20  ;;  %v1356_v27 = vmul.f32 %v3281_v21, %v3281_v21  ;;  %v1357_v28 = vmul.f32 %v3283_v24, %v3283_v24  ;;  %v1358_v23 = vmul.f32 %v3285_v25, %v3285_v25 }
 0x718   :  { %v1359_v29 = vadd.f32 %v1356_v27, %v1355_v26 }
 0x71a   :  { %v1360_v30 = vadd.f32 %v1359_v29, %v1357_v28  ;;  %v1265_v28 = vld [vmem:[%s3357_s8] sm:$0x1] }
 0x71c   :  { %v1361_v31 = vadd.f32 %v1360_v30, %v1358_v23  ;;  %v1562_v30 = vld [vmem:[%s3358_s13] sm:$0x1] }
 0x71e   :  { %v1362_v32 = vrot.slane %v1361_v31, 4 }
 0x71f   :  { %v2395_v33 = vpop.f32.mrb[12].mxu1 }
 0x720   :  { %v1547_v34 = vpop.f32.mrb[13].mxu1  ;;  %v1363_v35 = vadd.f32 %v1362_v32, %v1361_v31  ;;  %v1556_v46 = vadd.f32 %v2395_v33, %v1881_v36 }
 0x721   :  { %v2396_v41 = vpop.f32.mrb[14].mxu1  ;;  %v1548_v37 = vadd.f32 %v1881_v36, %v1547_v34 }
 0x722   :  { %v1550_v43 = vpop.f32.mrb[15].mxu1  ;;  %v1364_v12 = vrot.slane %v1363_v35, 2  ;;  %v1559_v50 = vadd.f32 %v2396_v41, %v1881_v36  ;;  %v1880_v41 = vld [vmem:[%s3359_s9] ss:$0 sm:$0xff] }
 0x723   :  { %v1551_v44 = vadd.f32 %v1881_v36, %v1550_v43 }
 0x724   :  { %v1365_v38 = vadd.f32 %v1364_v12, %v1363_v35  ;;  %v1888_v12 = vld [vmem:[%s3360_s14] ss:$0 sm:$0xff] }
 0x725   :  { %v1564_v47 = vadd.f32 %v1551_v44, %v1548_v37 }
 0x726   :  { %v1366_v40 = vrot.slane %v1365_v38, 1 }
 0x727   :  { %v1565_v53 = vadd.f32 %v1564_v47, %v1556_v46 }
 0x728   :  { %v1367_v49 = vadd.f32 %v1366_v40, %v1365_v38 }
 0x729   :  { %v1566_v54 = vadd.f32 %v1565_v53, %v1559_v50 }
 0x72a   :  { %2383 = vmatmul.mubr.f32.vlgmr.msra.gmra.mrb[8].mxu0 %v1367_v49 }
 0x72b   :  { %2613 = vmatpush3.bf16.msra.mxu0 %v2881_v18  ;;  %2429 = vmatprep.mubr.msk.f32.mxu0 %vm2754_vm1, %v2755_v52  ;;  %v1567_v56 = vrot.slane %v1566_v54, 4 }
 0x72c   :  { %2614 = vmatprep.subr.bf16.mxu0 %v2753_v1 }
 0x72d   :  { %v1568_v18 = vadd.f32 %v1567_v56, %v1566_v54 }
 0x72f   :  { %2616 = vmatpush3.bf16.msra.mxu0 %v2895_v22  ;;  %v1569_v52 = vrot.slane %v1568_v18, 2 }
 0x730   :  { %2617 = vmatprep.subr.bf16.mxu0 %v2753_v1 }
 0x731   :  { %v1570_v22 = vadd.f32 %v1569_v52, %v1568_v18 }
 0x733   :  { %2619 = vmatpush3.bf16.msra.mxu0 %v2942_v39  ;;  %v1571_v39 = vrot.slane %v1570_v22, 1 }
 0x734   :  { %2620 = vmatprep.subr.bf16.mxu0 %v2753_v1 }
 0x737   :  { %2622 = vmatpush3.bf16.msra.mxu0 %v2952_v42  ;;  %v1572_v42 = vadd.f32 %v1571_v39, %v1570_v22 }
 0x738   :  { %2623 = vmatprep.subr.bf16.mxu0 %v2753_v1 }
 0x73b   :  { %2625 = vmatpush3.bf16.msra.mxu0 %v2962_v45 }
 0x73c   :  { %2626 = vmatprep.subr.bf16.mxu0 %v2753_v1 }
 0x73f   :  { %2628 = vmatpush3.bf16.msra.mxu0 %v2972_v48 }
 0x740   :  { %2629 = vmatprep.subr.bf16.mxu0 %v2753_v1 }
 0x743   :  { %2631 = vmatpush3.bf16.msra.mxu0 %v2981_v51 }
 0x744   :  { %2632 = vmatprep.subr.bf16.mxu0 %v2753_v1 }
 0x747   :  { %2634 = vmatpush3.bf16.msra.mxu0 %v2997_v55 }
 0x74a   :  { %2430 = vmatmul.mubr.f32.vlgmr.msra.gmra.mrb[10].mxu0 %v1572_v42 }
 0x7fd   :  { %v1434_v57 = vpop.f32.mrb[8].mxu0 }
 0x7fe   :  { %v2384_v58 = vpop.f32.mrb[9].mxu0  ;;  %v1438_v14 = vmul.f32 0.001953125, %v1434_v57 }
 0x800   :  { %v1439_v15 = vadd.f32 1e-05, %v1438_v14 }
 0x802   :  { %2749 = vrsqrt.f32 %v1439_v15 }
 0x80c   :  { %v2750_v27 = vpop.eup %2749 }
 0x80d   :  { %v1441_v29 = vmul.f32 %v2750_v27, %v1265_v28 }
 0x80f   :  { %v1446_v23 = vrot.slane %v1441_v29, %v3026_v13 }
 0x811   :  { %v1448_v33 = vmul.f32 %v1446_v23, %v3279_v20  ;;  %v1449_v34 = vmul.f32 %v1446_v23, %v3281_v21  ;;  %v1450_v35 = vmul.f32 %v1446_v23, %v3283_v24  ;;  %v1451_v36 = vmul.f32 %v1446_v23, %v3285_v25 }
 0x813   :  { %v1458_v40 = vadd.f32 %v1880_v41, %v1448_v33  ;;  %v1459_v21 = vadd.f32 %v1880_v41, %v1449_v34  ;;  %v1461_v24 = vadd.f32 %v1880_v41, %v1451_v36 }
 0x81d   :  { %v1639_v45 = vpop.f32.mrb[10].mxu0 }
 0x81e   :  { %v1643_v61 = vmul.f32 0.001953125, %v1639_v45  ;;  %v2431_v0 = vpop.f32.mrb[11].mxu0 }
 0x820   :  { %v1647_v2 = vrot.slane %v1643_v61, %v3026_v13 }
 0x822   :  { %v1648_v48 = vsub.f32 %v1548_v37, %v1647_v2  ;;  %v1649_v4 = vsub.f32 %v1551_v44, %v1647_v2  ;;  %v1650_v5 = vsub.f32 %v1556_v46, %v1647_v2  ;;  %v1651_v6 = vsub.f32 %v1559_v50, %v1647_v2 }
 0x823   :  { %v1460_v46 = vadd.f32 %v1880_v41, %v1450_v35 }
 0x824   :  { %v1652_v7 = vmul.f32 %v1648_v48, %v1648_v48  ;;  %v1653_v51 = vmul.f32 %v1649_v4, %v1649_v4  ;;  %v1654_v62 = vmul.f32 %v1650_v5, %v1650_v5  ;;  %v1655_v63 = vmul.f32 %v1651_v6, %v1651_v6 }
 0x826   :  { %v1656_v1 = vadd.f32 %v1653_v51, %v1652_v7 }
 0x828   :  { %v1657_v8 = vadd.f32 %v1656_v1, %v1654_v62 }
 0x82a   :  { %v1658_v55 = vadd.f32 %v1657_v8, %v1655_v63 }
 0x82c   :  { %v1659_v59 = vrot.slane %v1658_v55, 4 }
 0x82e   :  { %v1660_v60 = vadd.f32 %v1659_v59, %v1658_v55 }
 0x830   :  { %v1661_v9 = vrot.slane %v1660_v60, 2 }
 0x832   :  { %v1662_v10 = vadd.f32 %v1661_v9, %v1660_v60 }
 0x834   :  { %v1663_v11 = vrot.slane %v1662_v10, 1 }
 0x836   :  { %v1664_v3 = vadd.f32 %v1663_v11, %v1662_v10 }
 0x838   :  { %2465 = vmatmul.mubr.f32.vlgmr.msra.gmra.mrb[10].mxu1 %v1664_v3 }
 0x90b   :  { %v1731_v16 = vpop.f32.mrb[10].mxu1 }
 0x90c   :  { %v1735_v17 = vmul.f32 0.001953125, %v1731_v16  ;;  %v2466_v19 = vpop.f32.mrb[11].mxu1 }
 0x90e   :  { %v1736_v26 = vadd.f32 1e-05, %v1735_v17 }
 0x910   :  { %2751 = vrsqrt.f32 %v1736_v26 }
 0x91a   :  { %v2752_v31 = vpop.eup %2751 }
 0x91b   :  { %v1738_v32 = vmul.f32 %v2752_v31, %v1562_v30 }
 0x91d   :  { %v1743_v43 = vrot.slane %v1738_v32, %v3026_v13 }
 0x91f   :  { %v1745_v37 = vmul.f32 %v1743_v43, %v1648_v48  ;;  %v1746_v44 = vmul.f32 %v1743_v43, %v1649_v4  ;;  %v1747_v38 = vmul.f32 %v1743_v43, %v1650_v5  ;;  %v1748_v20 = vmul.f32 %v1743_v43, %v1651_v6 }
 0x921   :  { %v1755_v47 = vadd.f32 %v1888_v12, %v1745_v37  ;;  %v1756_v25 = vadd.f32 %v1888_v12, %v1746_v44  ;;  %v1757_v49 = vadd.f32 %v1888_v12, %v1747_v38  ;;  %v1758_v50 = vadd.f32 %v1888_v12, %v1748_v20 }
 0x923   :  { %v1759_v53 = vadd.f32 %v1755_v47, %v1458_v40  ;;  %v1760_v54 = vadd.f32 %v1756_v25, %v1459_v21  ;;  %v1761_v56 = vadd.f32 %v1757_v49, %v1460_v46  ;;  %v1762_v13 = vadd.f32 %v1758_v50, %v1461_v24 }
 0x925   :  { %vm1763_vm7 = vcmp.ge.f32.partialorder %v1759_v53, 0.0  ;;  %vm1764_vm8 = vcmp.ge.f32.partialorder %v1760_v54, 0.0  ;;  %vm1765_vm9 = vcmp.ge.f32.partialorder %v1761_v56, 0.0  ;;  %vm1766_vm10 = vcmp.ge.f32.partialorder %v1762_v13, 0.0 }
 0x926   :  { %v1767_v18 = vmul.f32 0.1, %v1759_v53  ;;  %v1768_v52 = vmul.f32 0.1, %v1760_v54  ;;  %v1769_v22 = vmul.f32 0.1, %v1761_v56 }
 0x927   :  { %v1770_v39 = vmul.f32 0.1, %v1762_v13 }
 0x928   :  { %v1771_v42 = vsel %vm1763_vm7, %v1759_v53, %v1767_v18  ;;  %v1772_v57 = vsel %vm1764_vm8, %v1760_v54, %v1768_v52  ;;  %v1773_v58 = vsel %vm1765_vm9, %v1761_v56, %v1769_v22 }
 0x929   :  { %v1774_v45 = vsel %vm1766_vm10, %v1762_v13, %v1770_v39  ;;  %1775 = vst [vmem:[%s3361_s15] sm:$0xff] %v1771_v42  ;;  %1776 = vst [vmem:[%s3361_s15 + $0x8] sm:$0xff] %v1772_v57 }
 0x92a   :  { %1777 = vst [vmem:[%s3361_s15 + $0x10] sm:$0xff] %v1773_v58  ;;  %1778 = vst [vmem:[%s3361_s15 + $0x18] sm:$0xff] %v1774_v45 }

</bundles_post_ra>
